<compile_context>
chip_gen: v7x
topology: tpu7x:2x2x1
jax: 0.10.0
libtpu: 0.0.40
codegen_flags: <defaults>
</compile_context>

<pallas_src>
import jax
import jax.numpy as jnp
from jax import lax
from jax.experimental import pallas as pl
from jax.experimental.pallas import tpu as pltpu

# ---- problem sizes (small, consistent with the module) ----------------------
N = 2      # batch
C = 32     # channels == out_channels  -> skip connection is Identity
L = 16     # 1-D sequence length
E = 16     # emb_channels
G = 8      # norm_groups (module arg; must divide C)
EPS = 1e-6  # matches the module's Normalize(..., eps=1e-06) exactly

# Matmul operand dtype.  The MXU is bf16-native on v5e/v6e/v7x, so bf16 operands
# with f32 accumulation are legal everywhere; f32 is kept because at M=32/K=96
# the cast costs more than the tiny latency-bound matmuls save, and the harness
# checks against an f32 reference at 1e-4 tolerance.  Weights are pre-cast in
# prepare_params(); only the activation side is cast (and only if != f32).
MATMUL_DTYPE = jnp.float32

# Row indices inside the packed (8, C) parameter slab.
ROW_GN1_W, ROW_GN1_B, ROW_C1_B, ROW_LIN_B, ROW_GN2_W, ROW_GN2_B, ROW_C2_B = range(7)


# ---------------------------- in-kernel helpers -------------------------------
def _mm(a, b):
    """MXU matmul with f32 accumulation.  b (weights) is pre-cast in prepare_params."""
    if MATMUL_DTYPE != jnp.float32:
        a = a.astype(MATMUL_DTYPE)
    return jnp.dot(a, b, preferred_element_type=jnp.float32)


def _silu(z):
    return z * jax.nn.sigmoid(z)


def _group_norm(h, gamma, beta, group_masks, inv_cnt, eps):
    """GroupNorm over (L, C//G) per sample.  h: [N, L, C]; gamma/beta: [1, C].

    Pure VPU/XLU: sublane reduce over L, then masked lane reductions per channel
    group (no MXU one-hot matmuls, no minor-dim reshapes).  Variance is two-pass
    (subtract-mean) to avoid E[x^2]-E[x]^2 cancellation."""
    # Pass 1: per-group mean, broadcast back onto its lanes.
    s = jnp.sum(h, axis=1)                                        # [N, C]
    mean_c = jnp.zeros_like(s)
    for m in group_masks:                                         # m: [1, C]
        mean_c = mean_c + jnp.sum(s * m, axis=-1, keepdims=True) * m
    mean_c = mean_c * inv_cnt                                     # [N, C]

    # Pass 2: variance of the centered values.
    d = h - mean_c[:, None, :]                                    # [N, L, C]
    ss = jnp.sum(d * d, axis=1)                                   # [N, C]
    var_c = jnp.zeros_like(ss)
    for m in group_masks:
        var_c = var_c + jnp.sum(ss * m, axis=-1, keepdims=True) * m
    var_c = var_c * inv_cnt

    inv = lax.rsqrt(var_c + eps)
    return d * inv[:, None, :] * gamma + beta


def _conv1d_k3(h, w3, b, lhs_ref):
    """Conv1d(kernel=3, pad=1, stride=1) as ONE MXU matmul.

    h: [N, L, C] post-activation; w3: [3C, Cout] (taps stacked along rows,
    pre-cast); b: [1, Cout].  lhs_ref: [N*L, 3C] VMEM scratch whose per-sample
    halo slots (row i*L lanes [0,C) and row (i+1)*L-1 lanes [2C,3C)) are
    pre-zeroed by the kernel and never written here, so the +/-1 shifts along L
    come from three shifted tap stores per sample -- no concat, no reshape of
    the matmul LHS."""
    n, l, c = h.shape
    for i in range(n):
        hi = h[i]                                           # [L, C]
        r0 = i * l
        lhs_ref[r0 + 1:r0 + l, 0:c] = hi[0:l - 1, :]        # tap k=0: x[l-1]
        lhs_ref[r0:r0 + l, c:2 * c] = hi                    # tap k=1: x[l]
        lhs_ref[r0:r0 + l - 1, 2 * c:3 * c] = hi[1:l, :]    # tap k=2: x[l+1]
    y = _mm(lhs_ref[...], w3) + b                           # [N*L, Cout]
    return y.reshape(n, l, -1)                              # leading-dim split only


# --------------------------------- kernel -------------------------------------
def resblock_kernel(x_ref, emb_ref, vecs_ref, convw_ref, linw_ref, out_ref, lhs_ref):
    x = x_ref[...]                                # [N, L, C]  (NLC layout)
    n, l, c = x.shape
    cg = c // G

    vecs = vecs_ref[...]                          # [8, C] packed param slab
    row = lambda r: vecs[r:r + 1, :]              # static row slice -> [1, C]

    # Zero the per-sample conv halo slots of the shared matmul-LHS scratch once;
    # the tap stores in _conv1d_k3 never touch them, so both convs reuse them.
    zrow = jnp.zeros((1, c), jnp.float32)
    for i in range(n):
        lhs_ref[i * l:i * l + 1, 0:c] = zrow                          # left halo
        lhs_ref[(i + 1) * l - 1:(i + 1) * l, 2 * c:3 * c] = zrow      # right halo

    # Group-membership lane masks built once (JAX does not CSE broadcast_in_dim).
    lane = lax.broadcasted_iota(jnp.int32, (1, c), 1)
    masks = tuple(
        jnp.logical_and(lane >= g * cg, lane < (g + 1) * cg).astype(jnp.float32)
        for g in range(G))
    inv_cnt = 1.0 / float(l * cg)

    # in_layers: GroupNorm -> SiLU -> Conv1d(k=3, pad=1)
    h = _group_norm(x, row(ROW_GN1_W), row(ROW_GN1_B), masks, inv_cnt, EPS)
    h = _silu(h)
    h = _conv1d_k3(h, convw_ref[0], row(ROW_C1_B), lhs_ref)

    # emb_layers: SiLU -> Linear, broadcast-add over the length axis
    e = _mm(_silu(emb_ref[...]), linw_ref[...]) + row(ROW_LIN_B)      # [N, C]
    h = h + e[:, None, :]

    # out_layers: GroupNorm -> SiLU -> Dropout(p=0) -> Conv1d(k=3, pad=1)
    h = _group_norm(h, row(ROW_GN2_W), row(ROW_GN2_B), masks, inv_cnt, EPS)
    h = _silu(h)
    # TODO(synk): Dropout(p=0) is identity at inference; nonzero dropout not implemented.
    h = _conv1d_k3(h, convw_ref[1], row(ROW_C2_B), lhs_ref)

    # skip_connection is Identity because out_channels == channels
    out_ref[...] = (x + h).astype(out_ref.dtype)


# -------------------------------- wrappers -------------------------------------
def prepare_params(p):
    """One-time parameter packing: all reshape/transpose/stack/cast work is hoisted
    out of the forward path and the 12 tiny tensors are fused into 3 operands."""
    def fuse_conv_w(w):     # PyTorch [Cout, Cin, 3] -> [3*Cin, Cout], tap-major rows
        cout, cin, k = w.shape
        return jnp.transpose(w, (2, 1, 0)).reshape(k * cin, cout)

    vecs = jnp.stack([p["gn1_w"], p["gn1_b"], p["c1_b"], p["lin_b"],
                      p["gn2_w"], p["gn2_b"], p["c2_b"],
                      jnp.zeros((C,), jnp.float32)], axis=0)             # [8, C]
    convw = jnp.stack([fuse_conv_w(p["c1_w"]), fuse_conv_w(p["c2_w"])],
                      axis=0).astype(MATMUL_DTYPE)                       # [2, 3C, C]
    linw = p["lin_w"].T.astype(MATMUL_DTYPE)                             # [E, C]
    return dict(vecs=vecs, convw=convw, linw=linw)


def resblock_forward_nlc(x_nlc, emb, q):
    """Primary entry point: NLC in, NLC out -> no layout transposes anywhere.

    Scale-up path (not applied at this toy size): add a leading grid axis over
    batch blocks marked "parallel" in dimension_semantics so v7x uses both
    TensorCores and each conv matmul sees M >= 256."""
    args = (x_nlc, emb, q["vecs"], q["convw"], q["linw"])
    return pl.pallas_call(
        resblock_kernel,
        out_shape=jax.ShapeDtypeStruct((N, L, C), jnp.float32),
        in_specs=[pl.BlockSpec(memory_space=pltpu.MemorySpace.VMEM)] * len(args),
        out_specs=pl.BlockSpec(memory_space=pltpu.MemorySpace.VMEM),
        scratch_shapes=[pltpu.VMEM((N * L, 3 * C), jnp.float32)],   # shared conv LHS
        input_output_aliases={0: 0},    # output aliases x (same shape/dtype)
    )(*args)


def resblock_forward(x_ncl, emb, q):
    """PyTorch-layout (NCL) adapter.  Keep the surrounding model in NLC and call
    resblock_forward_nlc directly to drop these two boundary transposes."""
    out_nlc = resblock_forward_nlc(jnp.transpose(x_ncl, (0, 2, 1)), emb, q)
    return jnp.transpose(out_nlc, (0, 2, 1))


# ----------------------- pure-JAX reference (NCL) ------------------------------
def ref_forward(x, emb, p):
    def gn(z, w, b):                                  # z: [N, C, L]
        zr = z.reshape(N, G, (C // G) * L)
        m = zr.mean(-1, keepdims=True)
        v = zr.var(-1, keepdims=True)
        zn = ((zr - m) / jnp.sqrt(v + EPS)).reshape(N, C, L)
        return zn * w[None, :, None] + b[None, :, None]

    def conv(z, w, b):                                 # w: [O, I, 3]
        y = lax.conv_general_dilated(z, w, window_strides=(1,), padding=((1, 1),),
                                     dimension_numbers=("NCH", "OIH", "NCH"))
        return y + b[None, :, None]

    silu = lambda z: z * jax.nn.sigmoid(z)
    h = conv(silu(gn(x, p["gn1_w"], p["gn1_b"])), p["c1_w"], p["c1_b"])
    e = jnp.dot(silu(emb), p["lin_w"].T) + p["lin_b"]
    h = h + e[:, :, None]
    h = conv(silu(gn(h, p["gn2_w"], p["gn2_b"])), p["c2_w"], p["c2_b"])
    return x + h


# ---------------------------------- main ----------------------------------------
if __name__ == "__main__":
    key = jax.random.PRNGKey(0)
    ks = jax.random.split(key, 12)
    params = {
        "gn1_w": 1.0 + 0.1 * jax.random.normal(ks[0], (C,), jnp.float32),
        "gn1_b": 0.1 * jax.random.normal(ks[1], (C,), jnp.float32),
        "c1_w": 0.1 * jax.random.normal(ks[2], (C, C, 3), jnp.float32),
        "c1_b": 0.1 * jax.random.normal(ks[3], (C,), jnp.float32),
        "lin_w": 0.1 * jax.random.normal(ks[4], (C, E), jnp.float32),
        "lin_b": 0.1 * jax.random.normal(ks[5], (C,), jnp.float32),
        "gn2_w": 1.0 + 0.1 * jax.random.normal(ks[6], (C,), jnp.float32),
        "gn2_b": 0.1 * jax.random.normal(ks[7], (C,), jnp.float32),
        "c2_w": 0.1 * jax.random.normal(ks[8], (C, C, 3), jnp.float32),
        "c2_b": 0.1 * jax.random.normal(ks[9], (C,), jnp.float32),
    }
    x = jax.random.normal(ks[10], (N, C, L), jnp.float32)      # PyTorch NCL layout
    emb = jax.random.normal(ks[11], (N, E), jnp.float32)

    prepped = prepare_params(params)   # one-time parameter packing/fusion

    out = jax.block_until_ready(resblock_forward(x, emb, prepped))
    ref = jax.block_until_ready(ref_forward(x, emb, params))

    assert out.shape == (N, C, L)
    err = jnp.max(jnp.abs(out - ref))
    assert jnp.allclose(out, ref, atol=1e-4, rtol=1e-4), f"max abs err {err}"
    print("KERNEL_OK")
</pallas_src>

<mosaic_0001>
module attributes {stable_mosaic.version = 11 : i64} {
  func.func @resblock_kernel(%arg0: memref<2x16x32xf32, #tpu.memory_space<vmem>>, %arg1: memref<2x16xf32, #tpu.memory_space<vmem>>, %arg2: memref<8x32xf32, #tpu.memory_space<vmem>>, %arg3: memref<2x96x32xf32, #tpu.memory_space<vmem>>, %arg4: memref<16x32xf32, #tpu.memory_space<vmem>>, %arg5: memref<2x16x32xf32, #tpu.memory_space<vmem>>, %arg6: memref<32x96xf32, #tpu.memory_space<vmem>>) attributes {dimension_semantics = [], scalar_prefetch = 0 : i64, scratch_operands = 1 : i64, tpu.core_type = #tpu.core_type<tc>} {
    %c0 = arith.constant 0 : index
    %c0_0 = arith.constant 0 : index
    %c0_1 = arith.constant 0 : index
    %0 = vector.load %arg0[%c0, %c0_0, %c0_1] : memref<2x16x32xf32, #tpu.memory_space<vmem>>, vector<2x16x32xf32>
    %c0_2 = arith.constant 0 : index
    %c0_3 = arith.constant 0 : index
    %1 = vector.load %arg2[%c0_2, %c0_3] : memref<8x32xf32, #tpu.memory_space<vmem>>, vector<8x32xf32>
    %cst = arith.constant 0.000000e+00 : f32
    %2 = vector.broadcast %cst : f32 to vector<1x32xf32>
    %c0_4 = arith.constant 0 : index
    %c0_5 = arith.constant 0 : index
    %3 = vector.load %arg6[%c0_4, %c0_5] : memref<32x96xf32, #tpu.memory_space<vmem>>, vector<1x32xf32>
    tpu.vector_store %arg6[%c0_4, %c0_5], %2 {strides = array<i32>} : memref<32x96xf32, #tpu.memory_space<vmem>>, vector<1x32xf32>,
    %c15 = arith.constant 15 : index
    %c64 = arith.constant 64 : index
    %4 = vector.load %arg6[%c15, %c64] : memref<32x96xf32, #tpu.memory_space<vmem>>, vector<1x32xf32>
    tpu.vector_store %arg6[%c15, %c64], %2 {strides = array<i32>} : memref<32x96xf32, #tpu.memory_space<vmem>>, vector<1x32xf32>,
    %c16 = arith.constant 16 : index
    %c0_6 = arith.constant 0 : index
    %5 = vector.load %arg6[%c16, %c0_6] : memref<32x96xf32, #tpu.memory_space<vmem>>, vector<1x32xf32>
    tpu.vector_store %arg6[%c16, %c0_6], %2 {strides = array<i32>} : memref<32x96xf32, #tpu.memory_space<vmem>>, vector<1x32xf32>,
    %c31 = arith.constant 31 : index
    %c64_7 = arith.constant 64 : index
    %6 = vector.load %arg6[%c31, %c64_7] : memref<32x96xf32, #tpu.memory_space<vmem>>, vector<1x32xf32>
    tpu.vector_store %arg6[%c31, %c64_7], %2 {strides = array<i32>} : memref<32x96xf32, #tpu.memory_space<vmem>>, vector<1x32xf32>,
    %7 = tpu.iota {dimensions = array<i32: 1>} : vector<1x32xi32>
    %c0_i32 = arith.constant 0 : i32
    %8 = vector.broadcast %c0_i32 : i32 to vector<1x32xi32>
    %9 = arith.cmpi sge, %7, %8 : vector<1x32xi32>
    %c4_i32 = arith.constant 4 : i32
    %10 = vector.broadcast %c4_i32 : i32 to vector<1x32xi32>
    %11 = arith.cmpi slt, %7, %10 : vector<1x32xi32>
    %12 = arith.andi %9, %11 : vector<1x32xi1>
    %13 = arith.extui %12 : vector<1x32xi1> to vector<1x32xi32>
    %14 = arith.sitofp %13 : vector<1x32xi32> to vector<1x32xf32>
    %c4_i32_8 = arith.constant 4 : i32
    %15 = vector.broadcast %c4_i32_8 : i32 to vector<1x32xi32>
    %16 = arith.cmpi sge, %7, %15 : vector<1x32xi32>
    %c8_i32 = arith.constant 8 : i32
    %17 = vector.broadcast %c8_i32 : i32 to vector<1x32xi32>
    %18 = arith.cmpi slt, %7, %17 : vector<1x32xi32>
    %19 = arith.andi %16, %18 : vector<1x32xi1>
    %20 = arith.extui %19 : vector<1x32xi1> to vector<1x32xi32>
    %21 = arith.sitofp %20 : vector<1x32xi32> to vector<1x32xf32>
    %c8_i32_9 = arith.constant 8 : i32
    %22 = vector.broadcast %c8_i32_9 : i32 to vector<1x32xi32>
    %23 = arith.cmpi sge, %7, %22 : vector<1x32xi32>
    %c12_i32 = arith.constant 12 : i32
    %24 = vector.broadcast %c12_i32 : i32 to vector<1x32xi32>
    %25 = arith.cmpi slt, %7, %24 : vector<1x32xi32>
    %26 = arith.andi %23, %25 : vector<1x32xi1>
    %27 = arith.extui %26 : vector<1x32xi1> to vector<1x32xi32>
    %28 = arith.sitofp %27 : vector<1x32xi32> to vector<1x32xf32>
    %c12_i32_10 = arith.constant 12 : i32
    %29 = vector.broadcast %c12_i32_10 : i32 to vector<1x32xi32>
    %30 = arith.cmpi sge, %7, %29 : vector<1x32xi32>
    %c16_i32 = arith.constant 16 : i32
    %31 = vector.broadcast %c16_i32 : i32 to vector<1x32xi32>
    %32 = arith.cmpi slt, %7, %31 : vector<1x32xi32>
    %33 = arith.andi %30, %32 : vector<1x32xi1>
    %34 = arith.extui %33 : vector<1x32xi1> to vector<1x32xi32>
    %35 = arith.sitofp %34 : vector<1x32xi32> to vector<1x32xf32>
    %c16_i32_11 = arith.constant 16 : i32
    %36 = vector.broadcast %c16_i32_11 : i32 to vector<1x32xi32>
    %37 = arith.cmpi sge, %7, %36 : vector<1x32xi32>
    %c20_i32 = arith.constant 20 : i32
    %38 = vector.broadcast %c20_i32 : i32 to vector<1x32xi32>
    %39 = arith.cmpi slt, %7, %38 : vector<1x32xi32>
    %40 = arith.andi %37, %39 : vector<1x32xi1>
    %41 = arith.extui %40 : vector<1x32xi1> to vector<1x32xi32>
    %42 = arith.sitofp %41 : vector<1x32xi32> to vector<1x32xf32>
    %c20_i32_12 = arith.constant 20 : i32
    %43 = vector.broadcast %c20_i32_12 : i32 to vector<1x32xi32>
    %44 = arith.cmpi sge, %7, %43 : vector<1x32xi32>
    %c24_i32 = arith.constant 24 : i32
    %45 = vector.broadcast %c24_i32 : i32 to vector<1x32xi32>
    %46 = arith.cmpi slt, %7, %45 : vector<1x32xi32>
    %47 = arith.andi %44, %46 : vector<1x32xi1>
    %48 = arith.extui %47 : vector<1x32xi1> to vector<1x32xi32>
    %49 = arith.sitofp %48 : vector<1x32xi32> to vector<1x32xf32>
    %c24_i32_13 = arith.constant 24 : i32
    %50 = vector.broadcast %c24_i32_13 : i32 to vector<1x32xi32>
    %51 = arith.cmpi sge, %7, %50 : vector<1x32xi32>
    %c28_i32 = arith.constant 28 : i32
    %52 = vector.broadcast %c28_i32 : i32 to vector<1x32xi32>
    %53 = arith.cmpi slt, %7, %52 : vector<1x32xi32>
    %54 = arith.andi %51, %53 : vector<1x32xi1>
    %55 = arith.extui %54 : vector<1x32xi1> to vector<1x32xi32>
    %56 = arith.sitofp %55 : vector<1x32xi32> to vector<1x32xf32>
    %c28_i32_14 = arith.constant 28 : i32
    %57 = vector.broadcast %c28_i32_14 : i32 to vector<1x32xi32>
    %58 = arith.cmpi sge, %7, %57 : vector<1x32xi32>
    %c32_i32 = arith.constant 32 : i32
    %59 = vector.broadcast %c32_i32 : i32 to vector<1x32xi32>
    %60 = arith.cmpi slt, %7, %59 : vector<1x32xi32>
    %61 = arith.andi %58, %60 : vector<1x32xi1>
    %62 = arith.extui %61 : vector<1x32xi1> to vector<1x32xi32>
    %63 = arith.sitofp %62 : vector<1x32xi32> to vector<1x32xf32>
    %64 = vector.extract_strided_slice %1 {offsets = [0, 0], sizes = [1, 32], strides = [1, 1]} : vector<8x32xf32> to vector<1x32xf32>
    %65 = vector.extract_strided_slice %1 {offsets = [1, 0], sizes = [1, 32], strides = [1, 1]} : vector<8x32xf32> to vector<1x32xf32>
    %cst_15 = arith.constant dense<0.000000e+00> : vector<2x32xf32>
    %66 = vector.multi_reduction <add>, %0, %cst_15 [1] : vector<2x16x32xf32> to vector<2x32xf32>
    %cst_16 = arith.constant 0.000000e+00 : f32
    %67 = vector.broadcast %cst_16 : f32 to vector<2x32xf32>
    %68 = vector.broadcast %14 : vector<1x32xf32> to vector<2x32xf32>
    %69 = arith.mulf %66, %68 : vector<2x32xf32>
    %cst_17 = arith.constant dense<0.000000e+00> : vector<2xf32>
    %70 = vector.multi_reduction <add>, %69, %cst_17 [1] : vector<2x32xf32> to vector<2xf32>
    %71 = vector.shape_cast %70 : vector<2xf32> to vector<2x1xf32>
    %72 = vector.broadcast %71 : vector<2x1xf32> to vector<2x32xf32>
    %73 = vector.broadcast %14 : vector<1x32xf32> to vector<2x32xf32>
    %74 = arith.mulf %72, %73 : vector<2x32xf32>
    %75 = arith.addf %67, %74 : vector<2x32xf32>
    %76 = vector.broadcast %21 : vector<1x32xf32> to vector<2x32xf32>
    %77 = arith.mulf %66, %76 : vector<2x32xf32>
    %cst_18 = arith.constant dense<0.000000e+00> : vector<2xf32>
    %78 = vector.multi_reduction <add>, %77, %cst_18 [1] : vector<2x32xf32> to vector<2xf32>
    %79 = vector.shape_cast %78 : vector<2xf32> to vector<2x1xf32>
    %80 = vector.broadcast %79 : vector<2x1xf32> to vector<2x32xf32>
    %81 = vector.broadcast %21 : vector<1x32xf32> to vector<2x32xf32>
    %82 = arith.mulf %80, %81 : vector<2x32xf32>
    %83 = arith.addf %75, %82 : vector<2x32xf32>
    %84 = vector.broadcast %28 : vector<1x32xf32> to vector<2x32xf32>
    %85 = arith.mulf %66, %84 : vector<2x32xf32>
    %cst_19 = arith.constant dense<0.000000e+00> : vector<2xf32>
    %86 = vector.multi_reduction <add>, %85, %cst_19 [1] : vector<2x32xf32> to vector<2xf32>
    %87 = vector.shape_cast %86 : vector<2xf32> to vector<2x1xf32>
    %88 = vector.broadcast %87 : vector<2x1xf32> to vector<2x32xf32>
    %89 = vector.broadcast %28 : vector<1x32xf32> to vector<2x32xf32>
    %90 = arith.mulf %88, %89 : vector<2x32xf32>
    %91 = arith.addf %83, %90 : vector<2x32xf32>
    %92 = vector.broadcast %35 : vector<1x32xf32> to vector<2x32xf32>
    %93 = arith.mulf %66, %92 : vector<2x32xf32>
    %cst_20 = arith.constant dense<0.000000e+00> : vector<2xf32>
    %94 = vector.multi_reduction <add>, %93, %cst_20 [1] : vector<2x32xf32> to vector<2xf32>
    %95 = vector.shape_cast %94 : vector<2xf32> to vector<2x1xf32>
    %96 = vector.broadcast %95 : vector<2x1xf32> to vector<2x32xf32>
    %97 = vector.broadcast %35 : vector<1x32xf32> to vector<2x32xf32>
    %98 = arith.mulf %96, %97 : vector<2x32xf32>
    %99 = arith.addf %91, %98 : vector<2x32xf32>
    %100 = vector.broadcast %42 : vector<1x32xf32> to vector<2x32xf32>
    %101 = arith.mulf %66, %100 : vector<2x32xf32>
    %cst_21 = arith.constant dense<0.000000e+00> : vector<2xf32>
    %102 = vector.multi_reduction <add>, %101, %cst_21 [1] : vector<2x32xf32> to vector<2xf32>
    %103 = vector.shape_cast %102 : vector<2xf32> to vector<2x1xf32>
    %104 = vector.broadcast %103 : vector<2x1xf32> to vector<2x32xf32>
    %105 = vector.broadcast %42 : vector<1x32xf32> to vector<2x32xf32>
    %106 = arith.mulf %104, %105 : vector<2x32xf32>
    %107 = arith.addf %99, %106 : vector<2x32xf32>
    %108 = vector.broadcast %49 : vector<1x32xf32> to vector<2x32xf32>
    %109 = arith.mulf %66, %108 : vector<2x32xf32>
    %cst_22 = arith.constant dense<0.000000e+00> : vector<2xf32>
    %110 = vector.multi_reduction <add>, %109, %cst_22 [1] : vector<2x32xf32> to vector<2xf32>
    %111 = vector.shape_cast %110 : vector<2xf32> to vector<2x1xf32>
    %112 = vector.broadcast %111 : vector<2x1xf32> to vector<2x32xf32>
    %113 = vector.broadcast %49 : vector<1x32xf32> to vector<2x32xf32>
    %114 = arith.mulf %112, %113 : vector<2x32xf32>
    %115 = arith.addf %107, %114 : vector<2x32xf32>
    %116 = vector.broadcast %56 : vector<1x32xf32> to vector<2x32xf32>
    %117 = arith.mulf %66, %116 : vector<2x32xf32>
    %cst_23 = arith.constant dense<0.000000e+00> : vector<2xf32>
    %118 = vector.multi_reduction <add>, %117, %cst_23 [1] : vector<2x32xf32> to vector<2xf32>
    %119 = vector.shape_cast %118 : vector<2xf32> to vector<2x1xf32>
    %120 = vector.broadcast %119 : vector<2x1xf32> to vector<2x32xf32>
    %121 = vector.broadcast %56 : vector<1x32xf32> to vector<2x32xf32>
    %122 = arith.mulf %120, %121 : vector<2x32xf32>
    %123 = arith.addf %115, %122 : vector<2x32xf32>
    %124 = vector.broadcast %63 : vector<1x32xf32> to vector<2x32xf32>
    %125 = arith.mulf %66, %124 : vector<2x32xf32>
    %cst_24 = arith.constant dense<0.000000e+00> : vector<2xf32>
    %126 = vector.multi_reduction <add>, %125, %cst_24 [1] : vector<2x32xf32> to vector<2xf32>
    %127 = vector.shape_cast %126 : vector<2xf32> to vector<2x1xf32>
    %128 = vector.broadcast %127 : vector<2x1xf32> to vector<2x32xf32>
    %129 = vector.broadcast %63 : vector<1x32xf32> to vector<2x32xf32>
    %130 = arith.mulf %128, %129 : vector<2x32xf32>
    %131 = arith.addf %123, %130 : vector<2x32xf32>
    %cst_25 = arith.constant 1.562500e-02 : f32
    %132 = vector.broadcast %cst_25 : f32 to vector<2x32xf32>
    %133 = arith.mulf %131, %132 : vector<2x32xf32>
    %134 = vector.shape_cast %133 : vector<2x32xf32> to vector<2x1x32xf32>
    %135 = vector.broadcast %134 : vector<2x1x32xf32> to vector<2x16x32xf32>
    %136 = arith.subf %0, %135 : vector<2x16x32xf32>
    %137 = arith.mulf %136, %136 : vector<2x16x32xf32>
    %cst_26 = arith.constant dense<0.000000e+00> : vector<2x32xf32>
    %138 = vector.multi_reduction <add>, %137, %cst_26 [1] : vector<2x16x32xf32> to vector<2x32xf32>
    %cst_27 = arith.constant 0.000000e+00 : f32
    %139 = vector.broadcast %cst_27 : f32 to vector<2x32xf32>
    %140 = vector.broadcast %14 : vector<1x32xf32> to vector<2x32xf32>
    %141 = arith.mulf %138, %140 : vector<2x32xf32>
    %cst_28 = arith.constant dense<0.000000e+00> : vector<2xf32>
    %142 = vector.multi_reduction <add>, %141, %cst_28 [1] : vector<2x32xf32> to vector<2xf32>
    %143 = vector.shape_cast %142 : vector<2xf32> to vector<2x1xf32>
    %144 = vector.broadcast %143 : vector<2x1xf32> to vector<2x32xf32>
    %145 = vector.broadcast %14 : vector<1x32xf32> to vector<2x32xf32>
    %146 = arith.mulf %144, %145 : vector<2x32xf32>
    %147 = arith.addf %139, %146 : vector<2x32xf32>
    %148 = vector.broadcast %21 : vector<1x32xf32> to vector<2x32xf32>
    %149 = arith.mulf %138, %148 : vector<2x32xf32>
    %cst_29 = arith.constant dense<0.000000e+00> : vector<2xf32>
    %150 = vector.multi_reduction <add>, %149, %cst_29 [1] : vector<2x32xf32> to vector<2xf32>
    %151 = vector.shape_cast %150 : vector<2xf32> to vector<2x1xf32>
    %152 = vector.broadcast %151 : vector<2x1xf32> to vector<2x32xf32>
    %153 = vector.broadcast %21 : vector<1x32xf32> to vector<2x32xf32>
    %154 = arith.mulf %152, %153 : vector<2x32xf32>
    %155 = arith.addf %147, %154 : vector<2x32xf32>
    %156 = vector.broadcast %28 : vector<1x32xf32> to vector<2x32xf32>
    %157 = arith.mulf %138, %156 : vector<2x32xf32>
    %cst_30 = arith.constant dense<0.000000e+00> : vector<2xf32>
    %158 = vector.multi_reduction <add>, %157, %cst_30 [1] : vector<2x32xf32> to vector<2xf32>
    %159 = vector.shape_cast %158 : vector<2xf32> to vector<2x1xf32>
    %160 = vector.broadcast %159 : vector<2x1xf32> to vector<2x32xf32>
    %161 = vector.broadcast %28 : vector<1x32xf32> to vector<2x32xf32>
    %162 = arith.mulf %160, %161 : vector<2x32xf32>
    %163 = arith.addf %155, %162 : vector<2x32xf32>
    %164 = vector.broadcast %35 : vector<1x32xf32> to vector<2x32xf32>
    %165 = arith.mulf %138, %164 : vector<2x32xf32>
    %cst_31 = arith.constant dense<0.000000e+00> : vector<2xf32>
    %166 = vector.multi_reduction <add>, %165, %cst_31 [1] : vector<2x32xf32> to vector<2xf32>
    %167 = vector.shape_cast %166 : vector<2xf32> to vector<2x1xf32>
    %168 = vector.broadcast %167 : vector<2x1xf32> to vector<2x32xf32>
    %169 = vector.broadcast %35 : vector<1x32xf32> to vector<2x32xf32>
    %170 = arith.mulf %168, %169 : vector<2x32xf32>
    %171 = arith.addf %163, %170 : vector<2x32xf32>
    %172 = vector.broadcast %42 : vector<1x32xf32> to vector<2x32xf32>
    %173 = arith.mulf %138, %172 : vector<2x32xf32>
    %cst_32 = arith.constant dense<0.000000e+00> : vector<2xf32>
    %174 = vector.multi_reduction <add>, %173, %cst_32 [1] : vector<2x32xf32> to vector<2xf32>
    %175 = vector.shape_cast %174 : vector<2xf32> to vector<2x1xf32>
    %176 = vector.broadcast %175 : vector<2x1xf32> to vector<2x32xf32>
    %177 = vector.broadcast %42 : vector<1x32xf32> to vector<2x32xf32>
    %178 = arith.mulf %176, %177 : vector<2x32xf32>
    %179 = arith.addf %171, %178 : vector<2x32xf32>
    %180 = vector.broadcast %49 : vector<1x32xf32> to vector<2x32xf32>
    %181 = arith.mulf %138, %180 : vector<2x32xf32>
    %cst_33 = arith.constant dense<0.000000e+00> : vector<2xf32>
    %182 = vector.multi_reduction <add>, %181, %cst_33 [1] : vector<2x32xf32> to vector<2xf32>
    %183 = vector.shape_cast %182 : vector<2xf32> to vector<2x1xf32>
    %184 = vector.broadcast %183 : vector<2x1xf32> to vector<2x32xf32>
    %185 = vector.broadcast %49 : vector<1x32xf32> to vector<2x32xf32>
    %186 = arith.mulf %184, %185 : vector<2x32xf32>
    %187 = arith.addf %179, %186 : vector<2x32xf32>
    %188 = vector.broadcast %56 : vector<1x32xf32> to vector<2x32xf32>
    %189 = arith.mulf %138, %188 : vector<2x32xf32>
    %cst_34 = arith.constant dense<0.000000e+00> : vector<2xf32>
    %190 = vector.multi_reduction <add>, %189, %cst_34 [1] : vector<2x32xf32> to vector<2xf32>
    %191 = vector.shape_cast %190 : vector<2xf32> to vector<2x1xf32>
    %192 = vector.broadcast %191 : vector<2x1xf32> to vector<2x32xf32>
    %193 = vector.broadcast %56 : vector<1x32xf32> to vector<2x32xf32>
    %194 = arith.mulf %192, %193 : vector<2x32xf32>
    %195 = arith.addf %187, %194 : vector<2x32xf32>
    %196 = vector.broadcast %63 : vector<1x32xf32> to vector<2x32xf32>
    %197 = arith.mulf %138, %196 : vector<2x32xf32>
    %cst_35 = arith.constant dense<0.000000e+00> : vector<2xf32>
    %198 = vector.multi_reduction <add>, %197, %cst_35 [1] : vector<2x32xf32> to vector<2xf32>
    %199 = vector.shape_cast %198 : vector<2xf32> to vector<2x1xf32>
    %200 = vector.broadcast %199 : vector<2x1xf32> to vector<2x32xf32>
    %201 = vector.broadcast %63 : vector<1x32xf32> to vector<2x32xf32>
    %202 = arith.mulf %200, %201 : vector<2x32xf32>
    %203 = arith.addf %195, %202 : vector<2x32xf32>
    %cst_36 = arith.constant 1.562500e-02 : f32
    %204 = vector.broadcast %cst_36 : f32 to vector<2x32xf32>
    %205 = arith.mulf %203, %204 : vector<2x32xf32>
    %cst_37 = arith.constant 9.99999997E-7 : f32
    %206 = vector.broadcast %cst_37 : f32 to vector<2x32xf32>
    %207 = arith.addf %205, %206 : vector<2x32xf32>
    %208 = math.rsqrt %207 : vector<2x32xf32>
    %209 = vector.shape_cast %208 : vector<2x32xf32> to vector<2x1x32xf32>
    %210 = vector.broadcast %209 : vector<2x1x32xf32> to vector<2x16x32xf32>
    %211 = arith.mulf %136, %210 : vector<2x16x32xf32>
    %212 = vector.shape_cast %64 : vector<1x32xf32> to vector<1x1x32xf32>
    %213 = vector.broadcast %212 : vector<1x1x32xf32> to vector<2x16x32xf32>
    %214 = arith.mulf %211, %213 : vector<2x16x32xf32>
    %215 = vector.shape_cast %65 : vector<1x32xf32> to vector<1x1x32xf32>
    %216 = vector.broadcast %215 : vector<1x1x32xf32> to vector<2x16x32xf32>
    %217 = arith.addf %214, %216 : vector<2x16x32xf32>
    %218 = arith.negf %217 : vector<2x16x32xf32>
    %219 = math.exp %218 : vector<2x16x32xf32>
    %cst_38 = arith.constant 1.000000e+00 : f32
    %220 = vector.broadcast %cst_38 : f32 to vector<2x16x32xf32>
    %221 = arith.addf %220, %219 : vector<2x16x32xf32>
    %222 = arith.divf %220, %221 : vector<2x16x32xf32>
    %223 = arith.mulf %217, %222 : vector<2x16x32xf32>
    %c0_39 = arith.constant 0 : index
    %c0_40 = arith.constant 0 : index
    %c0_41 = arith.constant 0 : index
    %224 = vector.load %arg3[%c0_39, %c0_40, %c0_41] : memref<2x96x32xf32, #tpu.memory_space<vmem>>, vector<1x96x32xf32>
    %225 = vector.shape_cast %224 : vector<1x96x32xf32> to vector<96x32xf32>
    %226 = vector.extract_strided_slice %1 {offsets = [2, 0], sizes = [1, 32], strides = [1, 1]} : vector<8x32xf32> to vector<1x32xf32>
    %227 = vector.extract_strided_slice %223 {offsets = [0, 0, 0], sizes = [1, 16, 32], strides = [1, 1, 1]} : vector<2x16x32xf32> to vector<1x16x32xf32>
    %228 = vector.shape_cast %227 : vector<1x16x32xf32> to vector<16x32xf32>
    %229 = vector.extract_strided_slice %228 {offsets = [0, 0], sizes = [15, 32], strides = [1, 1]} : vector<16x32xf32> to vector<15x32xf32>
    %c1 = arith.constant 1 : index
    %c0_42 = arith.constant 0 : index
    %230 = vector.load %arg6[%c1, %c0_42] : memref<32x96xf32, #tpu.memory_space<vmem>>, vector<15x32xf32>
    tpu.vector_store %arg6[%c1, %c0_42], %229 {strides = array<i32>} : memref<32x96xf32, #tpu.memory_space<vmem>>, vector<15x32xf32>,
    %c0_43 = arith.constant 0 : index
    %c32 = arith.constant 32 : index
    %231 = vector.load %arg6[%c0_43, %c32] : memref<32x96xf32, #tpu.memory_space<vmem>>, vector<16x32xf32>
    tpu.vector_store %arg6[%c0_43, %c32], %228 {strides = array<i32>} : memref<32x96xf32, #tpu.memory_space<vmem>>, vector<16x32xf32>,
    %232 = vector.extract_strided_slice %228 {offsets = [1, 0], sizes = [15, 32], strides = [1, 1]} : vector<16x32xf32> to vector<15x32xf32>
    %c0_44 = arith.constant 0 : index
    %c64_45 = arith.constant 64 : index
    %233 = vector.load %arg6[%c0_44, %c64_45] : memref<32x96xf32, #tpu.memory_space<vmem>>, vector<15x32xf32>
    tpu.vector_store %arg6[%c0_44, %c64_45], %232 {strides = array<i32>} : memref<32x96xf32, #tpu.memory_space<vmem>>, vector<15x32xf32>,
    %234 = vector.extract_strided_slice %223 {offsets = [1, 0, 0], sizes = [1, 16, 32], strides = [1, 1, 1]} : vector<2x16x32xf32> to vector<1x16x32xf32>
    %235 = vector.shape_cast %234 : vector<1x16x32xf32> to vector<16x32xf32>
    %236 = vector.extract_strided_slice %235 {offsets = [0, 0], sizes = [15, 32], strides = [1, 1]} : vector<16x32xf32> to vector<15x32xf32>
    %c17 = arith.constant 17 : index
    %c0_46 = arith.constant 0 : index
    %237 = vector.load %arg6[%c17, %c0_46] : memref<32x96xf32, #tpu.memory_space<vmem>>, vector<15x32xf32>
    tpu.vector_store %arg6[%c17, %c0_46], %236 {strides = array<i32>} : memref<32x96xf32, #tpu.memory_space<vmem>>, vector<15x32xf32>,
    %c16_47 = arith.constant 16 : index
    %c32_48 = arith.constant 32 : index
    %238 = vector.load %arg6[%c16_47, %c32_48] : memref<32x96xf32, #tpu.memory_space<vmem>>, vector<16x32xf32>
    tpu.vector_store %arg6[%c16_47, %c32_48], %235 {strides = array<i32>} : memref<32x96xf32, #tpu.memory_space<vmem>>, vector<16x32xf32>,
    %239 = vector.extract_strided_slice %235 {offsets = [1, 0], sizes = [15, 32], strides = [1, 1]} : vector<16x32xf32> to vector<15x32xf32>
    %c16_49 = arith.constant 16 : index
    %c64_50 = arith.constant 64 : index
    %240 = vector.load %arg6[%c16_49, %c64_50] : memref<32x96xf32, #tpu.memory_space<vmem>>, vector<15x32xf32>
    tpu.vector_store %arg6[%c16_49, %c64_50], %239 {strides = array<i32>} : memref<32x96xf32, #tpu.memory_space<vmem>>, vector<15x32xf32>,
    %c0_51 = arith.constant 0 : index
    %c0_52 = arith.constant 0 : index
    %241 = vector.load %arg6[%c0_51, %c0_52] : memref<32x96xf32, #tpu.memory_space<vmem>>, vector<32x96xf32>
    %cst_53 = arith.constant dense<0.000000e+00> : vector<32x32xf32>
    %242 = tpu.matmul %241, %225, %cst_53 {dimension_numbers = #tpu.dot_dimension_numbers<[1], [0], [0], [1], [0, 0, 1, 1], [], []>} : vector<32x96xf32>, vector<96x32xf32>, vector<32x32xf32> -> vector<32x32xf32>
    %243 = vector.broadcast %226 : vector<1x32xf32> to vector<32x32xf32>
    %244 = arith.addf %242, %243 : vector<32x32xf32>
    %245 = vector.shape_cast %244 : vector<32x32xf32> to vector<2x16x32xf32>
    %c0_54 = arith.constant 0 : index
    %c0_55 = arith.constant 0 : index
    %246 = vector.load %arg1[%c0_54, %c0_55] : memref<2x16xf32, #tpu.memory_space<vmem>>, vector<2x16xf32>
    %247 = arith.negf %246 : vector<2x16xf32>
    %248 = math.exp %247 : vector<2x16xf32>
    %cst_56 = arith.constant 1.000000e+00 : f32
    %249 = vector.broadcast %cst_56 : f32 to vector<2x16xf32>
    %250 = arith.addf %249, %248 : vector<2x16xf32>
    %251 = arith.divf %249, %250 : vector<2x16xf32>
    %252 = arith.mulf %246, %251 : vector<2x16xf32>
    %c0_57 = arith.constant 0 : index
    %c0_58 = arith.constant 0 : index
    %253 = vector.load %arg4[%c0_57, %c0_58] : memref<16x32xf32, #tpu.memory_space<vmem>>, vector<16x32xf32>
    %cst_59 = arith.constant dense<0.000000e+00> : vector<2x32xf32>
    %254 = tpu.matmul %252, %253, %cst_59 {dimension_numbers = #tpu.dot_dimension_numbers<[1], [0], [0], [1], [0, 0, 1, 1], [], []>} : vector<2x16xf32>, vector<16x32xf32>, vector<2x32xf32> -> vector<2x32xf32>
    %255 = vector.extract_strided_slice %1 {offsets = [3, 0], sizes = [1, 32], strides = [1, 1]} : vector<8x32xf32> to vector<1x32xf32>
    %256 = vector.broadcast %255 : vector<1x32xf32> to vector<2x32xf32>
    %257 = arith.addf %254, %256 : vector<2x32xf32>
    %258 = vector.shape_cast %257 : vector<2x32xf32> to vector<2x1x32xf32>
    %259 = vector.broadcast %258 : vector<2x1x32xf32> to vector<2x16x32xf32>
    %260 = arith.addf %245, %259 : vector<2x16x32xf32>
    %261 = vector.extract_strided_slice %1 {offsets = [4, 0], sizes = [1, 32], strides = [1, 1]} : vector<8x32xf32> to vector<1x32xf32>
    %262 = vector.extract_strided_slice %1 {offsets = [5, 0], sizes = [1, 32], strides = [1, 1]} : vector<8x32xf32> to vector<1x32xf32>
    %cst_60 = arith.constant dense<0.000000e+00> : vector<2x32xf32>
    %263 = vector.multi_reduction <add>, %260, %cst_60 [1] : vector<2x16x32xf32> to vector<2x32xf32>
    %cst_61 = arith.constant 0.000000e+00 : f32
    %264 = vector.broadcast %cst_61 : f32 to vector<2x32xf32>
    %265 = vector.broadcast %14 : vector<1x32xf32> to vector<2x32xf32>
    %266 = arith.mulf %263, %265 : vector<2x32xf32>
    %cst_62 = arith.constant dense<0.000000e+00> : vector<2xf32>
    %267 = vector.multi_reduction <add>, %266, %cst_62 [1] : vector<2x32xf32> to vector<2xf32>
    %268 = vector.shape_cast %267 : vector<2xf32> to vector<2x1xf32>
    %269 = vector.broadcast %268 : vector<2x1xf32> to vector<2x32xf32>
    %270 = vector.broadcast %14 : vector<1x32xf32> to vector<2x32xf32>
    %271 = arith.mulf %269, %270 : vector<2x32xf32>
    %272 = arith.addf %264, %271 : vector<2x32xf32>
    %273 = vector.broadcast %21 : vector<1x32xf32> to vector<2x32xf32>
    %274 = arith.mulf %263, %273 : vector<2x32xf32>
    %cst_63 = arith.constant dense<0.000000e+00> : vector<2xf32>
    %275 = vector.multi_reduction <add>, %274, %cst_63 [1] : vector<2x32xf32> to vector<2xf32>
    %276 = vector.shape_cast %275 : vector<2xf32> to vector<2x1xf32>
    %277 = vector.broadcast %276 : vector<2x1xf32> to vector<2x32xf32>
    %278 = vector.broadcast %21 : vector<1x32xf32> to vector<2x32xf32>
    %279 = arith.mulf %277, %278 : vector<2x32xf32>
    %280 = arith.addf %272, %279 : vector<2x32xf32>
    %281 = vector.broadcast %28 : vector<1x32xf32> to vector<2x32xf32>
    %282 = arith.mulf %263, %281 : vector<2x32xf32>
    %cst_64 = arith.constant dense<0.000000e+00> : vector<2xf32>
    %283 = vector.multi_reduction <add>, %282, %cst_64 [1] : vector<2x32xf32> to vector<2xf32>
    %284 = vector.shape_cast %283 : vector<2xf32> to vector<2x1xf32>
    %285 = vector.broadcast %284 : vector<2x1xf32> to vector<2x32xf32>
    %286 = vector.broadcast %28 : vector<1x32xf32> to vector<2x32xf32>
    %287 = arith.mulf %285, %286 : vector<2x32xf32>
    %288 = arith.addf %280, %287 : vector<2x32xf32>
    %289 = vector.broadcast %35 : vector<1x32xf32> to vector<2x32xf32>
    %290 = arith.mulf %263, %289 : vector<2x32xf32>
    %cst_65 = arith.constant dense<0.000000e+00> : vector<2xf32>
    %291 = vector.multi_reduction <add>, %290, %cst_65 [1] : vector<2x32xf32> to vector<2xf32>
    %292 = vector.shape_cast %291 : vector<2xf32> to vector<2x1xf32>
    %293 = vector.broadcast %292 : vector<2x1xf32> to vector<2x32xf32>
    %294 = vector.broadcast %35 : vector<1x32xf32> to vector<2x32xf32>
    %295 = arith.mulf %293, %294 : vector<2x32xf32>
    %296 = arith.addf %288, %295 : vector<2x32xf32>
    %297 = vector.broadcast %42 : vector<1x32xf32> to vector<2x32xf32>
    %298 = arith.mulf %263, %297 : vector<2x32xf32>
    %cst_66 = arith.constant dense<0.000000e+00> : vector<2xf32>
    %299 = vector.multi_reduction <add>, %298, %cst_66 [1] : vector<2x32xf32> to vector<2xf32>
    %300 = vector.shape_cast %299 : vector<2xf32> to vector<2x1xf32>
    %301 = vector.broadcast %300 : vector<2x1xf32> to vector<2x32xf32>
    %302 = vector.broadcast %42 : vector<1x32xf32> to vector<2x32xf32>
    %303 = arith.mulf %301, %302 : vector<2x32xf32>
    %304 = arith.addf %296, %303 : vector<2x32xf32>
    %305 = vector.broadcast %49 : vector<1x32xf32> to vector<2x32xf32>
    %306 = arith.mulf %263, %305 : vector<2x32xf32>
    %cst_67 = arith.constant dense<0.000000e+00> : vector<2xf32>
    %307 = vector.multi_reduction <add>, %306, %cst_67 [1] : vector<2x32xf32> to vector<2xf32>
    %308 = vector.shape_cast %307 : vector<2xf32> to vector<2x1xf32>
    %309 = vector.broadcast %308 : vector<2x1xf32> to vector<2x32xf32>
    %310 = vector.broadcast %49 : vector<1x32xf32> to vector<2x32xf32>
    %311 = arith.mulf %309, %310 : vector<2x32xf32>
    %312 = arith.addf %304, %311 : vector<2x32xf32>
    %313 = vector.broadcast %56 : vector<1x32xf32> to vector<2x32xf32>
    %314 = arith.mulf %263, %313 : vector<2x32xf32>
    %cst_68 = arith.constant dense<0.000000e+00> : vector<2xf32>
    %315 = vector.multi_reduction <add>, %314, %cst_68 [1] : vector<2x32xf32> to vector<2xf32>
    %316 = vector.shape_cast %315 : vector<2xf32> to vector<2x1xf32>
    %317 = vector.broadcast %316 : vector<2x1xf32> to vector<2x32xf32>
    %318 = vector.broadcast %56 : vector<1x32xf32> to vector<2x32xf32>
    %319 = arith.mulf %317, %318 : vector<2x32xf32>
    %320 = arith.addf %312, %319 : vector<2x32xf32>
    %321 = vector.broadcast %63 : vector<1x32xf32> to vector<2x32xf32>
    %322 = arith.mulf %263, %321 : vector<2x32xf32>
    %cst_69 = arith.constant dense<0.000000e+00> : vector<2xf32>
    %323 = vector.multi_reduction <add>, %322, %cst_69 [1] : vector<2x32xf32> to vector<2xf32>
    %324 = vector.shape_cast %323 : vector<2xf32> to vector<2x1xf32>
    %325 = vector.broadcast %324 : vector<2x1xf32> to vector<2x32xf32>
    %326 = vector.broadcast %63 : vector<1x32xf32> to vector<2x32xf32>
    %327 = arith.mulf %325, %326 : vector<2x32xf32>
    %328 = arith.addf %320, %327 : vector<2x32xf32>
    %cst_70 = arith.constant 1.562500e-02 : f32
    %329 = vector.broadcast %cst_70 : f32 to vector<2x32xf32>
    %330 = arith.mulf %328, %329 : vector<2x32xf32>
    %331 = vector.shape_cast %330 : vector<2x32xf32> to vector<2x1x32xf32>
    %332 = vector.broadcast %331 : vector<2x1x32xf32> to vector<2x16x32xf32>
    %333 = arith.subf %260, %332 : vector<2x16x32xf32>
    %334 = arith.mulf %333, %333 : vector<2x16x32xf32>
    %cst_71 = arith.constant dense<0.000000e+00> : vector<2x32xf32>
    %335 = vector.multi_reduction <add>, %334, %cst_71 [1] : vector<2x16x32xf32> to vector<2x32xf32>
    %cst_72 = arith.constant 0.000000e+00 : f32
    %336 = vector.broadcast %cst_72 : f32 to vector<2x32xf32>
    %337 = vector.broadcast %14 : vector<1x32xf32> to vector<2x32xf32>
    %338 = arith.mulf %335, %337 : vector<2x32xf32>
    %cst_73 = arith.constant dense<0.000000e+00> : vector<2xf32>
    %339 = vector.multi_reduction <add>, %338, %cst_73 [1] : vector<2x32xf32> to vector<2xf32>
    %340 = vector.shape_cast %339 : vector<2xf32> to vector<2x1xf32>
    %341 = vector.broadcast %340 : vector<2x1xf32> to vector<2x32xf32>
    %342 = vector.broadcast %14 : vector<1x32xf32> to vector<2x32xf32>
    %343 = arith.mulf %341, %342 : vector<2x32xf32>
    %344 = arith.addf %336, %343 : vector<2x32xf32>
    %345 = vector.broadcast %21 : vector<1x32xf32> to vector<2x32xf32>
    %346 = arith.mulf %335, %345 : vector<2x32xf32>
    %cst_74 = arith.constant dense<0.000000e+00> : vector<2xf32>
    %347 = vector.multi_reduction <add>, %346, %cst_74 [1] : vector<2x32xf32> to vector<2xf32>
    %348 = vector.shape_cast %347 : vector<2xf32> to vector<2x1xf32>
    %349 = vector.broadcast %348 : vector<2x1xf32> to vector<2x32xf32>
    %350 = vector.broadcast %21 : vector<1x32xf32> to vector<2x32xf32>
    %351 = arith.mulf %349, %350 : vector<2x32xf32>
    %352 = arith.addf %344, %351 : vector<2x32xf32>
    %353 = vector.broadcast %28 : vector<1x32xf32> to vector<2x32xf32>
    %354 = arith.mulf %335, %353 : vector<2x32xf32>
    %cst_75 = arith.constant dense<0.000000e+00> : vector<2xf32>
    %355 = vector.multi_reduction <add>, %354, %cst_75 [1] : vector<2x32xf32> to vector<2xf32>
    %356 = vector.shape_cast %355 : vector<2xf32> to vector<2x1xf32>
    %357 = vector.broadcast %356 : vector<2x1xf32> to vector<2x32xf32>
    %358 = vector.broadcast %28 : vector<1x32xf32> to vector<2x32xf32>
    %359 = arith.mulf %357, %358 : vector<2x32xf32>
    %360 = arith.addf %352, %359 : vector<2x32xf32>
    %361 = vector.broadcast %35 : vector<1x32xf32> to vector<2x32xf32>
    %362 = arith.mulf %335, %361 : vector<2x32xf32>
    %cst_76 = arith.constant dense<0.000000e+00> : vector<2xf32>
    %363 = vector.multi_reduction <add>, %362, %cst_76 [1] : vector<2x32xf32> to vector<2xf32>
    %364 = vector.shape_cast %363 : vector<2xf32> to vector<2x1xf32>
    %365 = vector.broadcast %364 : vector<2x1xf32> to vector<2x32xf32>
    %366 = vector.broadcast %35 : vector<1x32xf32> to vector<2x32xf32>
    %367 = arith.mulf %365, %366 : vector<2x32xf32>
    %368 = arith.addf %360, %367 : vector<2x32xf32>
    %369 = vector.broadcast %42 : vector<1x32xf32> to vector<2x32xf32>
    %370 = arith.mulf %335, %369 : vector<2x32xf32>
    %cst_77 = arith.constant dense<0.000000e+00> : vector<2xf32>
    %371 = vector.multi_reduction <add>, %370, %cst_77 [1] : vector<2x32xf32> to vector<2xf32>
    %372 = vector.shape_cast %371 : vector<2xf32> to vector<2x1xf32>
    %373 = vector.broadcast %372 : vector<2x1xf32> to vector<2x32xf32>
    %374 = vector.broadcast %42 : vector<1x32xf32> to vector<2x32xf32>
    %375 = arith.mulf %373, %374 : vector<2x32xf32>
    %376 = arith.addf %368, %375 : vector<2x32xf32>
    %377 = vector.broadcast %49 : vector<1x32xf32> to vector<2x32xf32>
    %378 = arith.mulf %335, %377 : vector<2x32xf32>
    %cst_78 = arith.constant dense<0.000000e+00> : vector<2xf32>
    %379 = vector.multi_reduction <add>, %378, %cst_78 [1] : vector<2x32xf32> to vector<2xf32>
    %380 = vector.shape_cast %379 : vector<2xf32> to vector<2x1xf32>
    %381 = vector.broadcast %380 : vector<2x1xf32> to vector<2x32xf32>
    %382 = vector.broadcast %49 : vector<1x32xf32> to vector<2x32xf32>
    %383 = arith.mulf %381, %382 : vector<2x32xf32>
    %384 = arith.addf %376, %383 : vector<2x32xf32>
    %385 = vector.broadcast %56 : vector<1x32xf32> to vector<2x32xf32>
    %386 = arith.mulf %335, %385 : vector<2x32xf32>
    %cst_79 = arith.constant dense<0.000000e+00> : vector<2xf32>
    %387 = vector.multi_reduction <add>, %386, %cst_79 [1] : vector<2x32xf32> to vector<2xf32>
    %388 = vector.shape_cast %387 : vector<2xf32> to vector<2x1xf32>
    %389 = vector.broadcast %388 : vector<2x1xf32> to vector<2x32xf32>
    %390 = vector.broadcast %56 : vector<1x32xf32> to vector<2x32xf32>
    %391 = arith.mulf %389, %390 : vector<2x32xf32>
    %392 = arith.addf %384, %391 : vector<2x32xf32>
    %393 = vector.broadcast %63 : vector<1x32xf32> to vector<2x32xf32>
    %394 = arith.mulf %335, %393 : vector<2x32xf32>
    %cst_80 = arith.constant dense<0.000000e+00> : vector<2xf32>
    %395 = vector.multi_reduction <add>, %394, %cst_80 [1] : vector<2x32xf32> to vector<2xf32>
    %396 = vector.shape_cast %395 : vector<2xf32> to vector<2x1xf32>
    %397 = vector.broadcast %396 : vector<2x1xf32> to vector<2x32xf32>
    %398 = vector.broadcast %63 : vector<1x32xf32> to vector<2x32xf32>
    %399 = arith.mulf %397, %398 : vector<2x32xf32>
    %400 = arith.addf %392, %399 : vector<2x32xf32>
    %cst_81 = arith.constant 1.562500e-02 : f32
    %401 = vector.broadcast %cst_81 : f32 to vector<2x32xf32>
    %402 = arith.mulf %400, %401 : vector<2x32xf32>
    %cst_82 = arith.constant 9.99999997E-7 : f32
    %403 = vector.broadcast %cst_82 : f32 to vector<2x32xf32>
    %404 = arith.addf %402, %403 : vector<2x32xf32>
    %405 = math.rsqrt %404 : vector<2x32xf32>
    %406 = vector.shape_cast %405 : vector<2x32xf32> to vector<2x1x32xf32>
    %407 = vector.broadcast %406 : vector<2x1x32xf32> to vector<2x16x32xf32>
    %408 = arith.mulf %333, %407 : vector<2x16x32xf32>
    %409 = vector.shape_cast %261 : vector<1x32xf32> to vector<1x1x32xf32>
    %410 = vector.broadcast %409 : vector<1x1x32xf32> to vector<2x16x32xf32>
    %411 = arith.mulf %408, %410 : vector<2x16x32xf32>
    %412 = vector.shape_cast %262 : vector<1x32xf32> to vector<1x1x32xf32>
    %413 = vector.broadcast %412 : vector<1x1x32xf32> to vector<2x16x32xf32>
    %414 = arith.addf %411, %413 : vector<2x16x32xf32>
    %415 = arith.negf %414 : vector<2x16x32xf32>
    %416 = math.exp %415 : vector<2x16x32xf32>
    %cst_83 = arith.constant 1.000000e+00 : f32
    %417 = vector.broadcast %cst_83 : f32 to vector<2x16x32xf32>
    %418 = arith.addf %417, %416 : vector<2x16x32xf32>
    %419 = arith.divf %417, %418 : vector<2x16x32xf32>
    %420 = arith.mulf %414, %419 : vector<2x16x32xf32>
    %c1_84 = arith.constant 1 : index
    %c0_85 = arith.constant 0 : index
    %c0_86 = arith.constant 0 : index
    %421 = vector.load %arg3[%c1_84, %c0_85, %c0_86] : memref<2x96x32xf32, #tpu.memory_space<vmem>>, vector<1x96x32xf32>
    %422 = vector.shape_cast %421 : vector<1x96x32xf32> to vector<96x32xf32>
    %423 = vector.extract_strided_slice %1 {offsets = [6, 0], sizes = [1, 32], strides = [1, 1]} : vector<8x32xf32> to vector<1x32xf32>
    %424 = vector.extract_strided_slice %420 {offsets = [0, 0, 0], sizes = [1, 16, 32], strides = [1, 1, 1]} : vector<2x16x32xf32> to vector<1x16x32xf32>
    %425 = vector.shape_cast %424 : vector<1x16x32xf32> to vector<16x32xf32>
    %426 = vector.extract_strided_slice %425 {offsets = [0, 0], sizes = [15, 32], strides = [1, 1]} : vector<16x32xf32> to vector<15x32xf32>
    %c1_87 = arith.constant 1 : index
    %c0_88 = arith.constant 0 : index
    %427 = vector.load %arg6[%c1_87, %c0_88] : memref<32x96xf32, #tpu.memory_space<vmem>>, vector<15x32xf32>
    tpu.vector_store %arg6[%c1_87, %c0_88], %426 {strides = array<i32>} : memref<32x96xf32, #tpu.memory_space<vmem>>, vector<15x32xf32>,
    %c0_89 = arith.constant 0 : index
    %c32_90 = arith.constant 32 : index
    %428 = vector.load %arg6[%c0_89, %c32_90] : memref<32x96xf32, #tpu.memory_space<vmem>>, vector<16x32xf32>
    tpu.vector_store %arg6[%c0_89, %c32_90], %425 {strides = array<i32>} : memref<32x96xf32, #tpu.memory_space<vmem>>, vector<16x32xf32>,
    %429 = vector.extract_strided_slice %425 {offsets = [1, 0], sizes = [15, 32], strides = [1, 1]} : vector<16x32xf32> to vector<15x32xf32>
    %c0_91 = arith.constant 0 : index
    %c64_92 = arith.constant 64 : index
    %430 = vector.load %arg6[%c0_91, %c64_92] : memref<32x96xf32, #tpu.memory_space<vmem>>, vector<15x32xf32>
    tpu.vector_store %arg6[%c0_91, %c64_92], %429 {strides = array<i32>} : memref<32x96xf32, #tpu.memory_space<vmem>>, vector<15x32xf32>,
    %431 = vector.extract_strided_slice %420 {offsets = [1, 0, 0], sizes = [1, 16, 32], strides = [1, 1, 1]} : vector<2x16x32xf32> to vector<1x16x32xf32>
    %432 = vector.shape_cast %431 : vector<1x16x32xf32> to vector<16x32xf32>
    %433 = vector.extract_strided_slice %432 {offsets = [0, 0], sizes = [15, 32], strides = [1, 1]} : vector<16x32xf32> to vector<15x32xf32>
    %c17_93 = arith.constant 17 : index
    %c0_94 = arith.constant 0 : index
    %434 = vector.load %arg6[%c17_93, %c0_94] : memref<32x96xf32, #tpu.memory_space<vmem>>, vector<15x32xf32>
    tpu.vector_store %arg6[%c17_93, %c0_94], %433 {strides = array<i32>} : memref<32x96xf32, #tpu.memory_space<vmem>>, vector<15x32xf32>,
    %c16_95 = arith.constant 16 : index
    %c32_96 = arith.constant 32 : index
    %435 = vector.load %arg6[%c16_95, %c32_96] : memref<32x96xf32, #tpu.memory_space<vmem>>, vector<16x32xf32>
    tpu.vector_store %arg6[%c16_95, %c32_96], %432 {strides = array<i32>} : memref<32x96xf32, #tpu.memory_space<vmem>>, vector<16x32xf32>,
    %436 = vector.extract_strided_slice %432 {offsets = [1, 0], sizes = [15, 32], strides = [1, 1]} : vector<16x32xf32> to vector<15x32xf32>
    %c16_97 = arith.constant 16 : index
    %c64_98 = arith.constant 64 : index
    %437 = vector.load %arg6[%c16_97, %c64_98] : memref<32x96xf32, #tpu.memory_space<vmem>>, vector<15x32xf32>
    tpu.vector_store %arg6[%c16_97, %c64_98], %436 {strides = array<i32>} : memref<32x96xf32, #tpu.memory_space<vmem>>, vector<15x32xf32>,
    %c0_99 = arith.constant 0 : index
    %c0_100 = arith.constant 0 : index
    %438 = vector.load %arg6[%c0_99, %c0_100] : memref<32x96xf32, #tpu.memory_space<vmem>>, vector<32x96xf32>
    %cst_101 = arith.constant dense<0.000000e+00> : vector<32x32xf32>
    %439 = tpu.matmul %438, %422, %cst_101 {dimension_numbers = #tpu.dot_dimension_numbers<[1], [0], [0], [1], [0, 0, 1, 1], [], []>} : vector<32x96xf32>, vector<96x32xf32>, vector<32x32xf32> -> vector<32x32xf32>
    %440 = vector.broadcast %423 : vector<1x32xf32> to vector<32x32xf32>
    %441 = arith.addf %439, %440 : vector<32x32xf32>
    %442 = vector.shape_cast %441 : vector<32x32xf32> to vector<2x16x32xf32>
    %443 = arith.addf %0, %442 : vector<2x16x32xf32>
    %c0_102 = arith.constant 0 : index
    %c0_103 = arith.constant 0 : index
    %c0_104 = arith.constant 0 : index
    %444 = vector.load %arg5[%c0_102, %c0_103, %c0_104] : memref<2x16x32xf32, #tpu.memory_space<vmem>>, vector<2x16x32xf32>
    tpu.vector_store %arg5[%c0_102, %c0_103, %c0_104], %443 {strides = array<i32>} : memref<2x16x32xf32, #tpu.memory_space<vmem>>, vector<2x16x32xf32>,
    return
  }
}

</mosaic_0001>

<bundles_post_ra>
// kernel: tpu_custom_call.1
= control target key start
LH: loop header
LB: loop body
LE: loop exit
PB: predicated region body
PF: predicated region fallthrough
CT: control target
= control target key end

     0   :  { %10 = vsyncpa [#allocation4], 0  ;;  %s2135_s0 = inlined_call_operand.hbm [shape: f32[2,16,32], index: 0, kind: input, shape index: {}, may-alias: {0,5}]   ;;  %s2136_s1 = inlined_call_operand.vmem [shape: f32[2,16], index: 1, kind: input, shape index: {}]   ;;  %s2137_s2 = inlined_call_operand.vmem [shape: f32[8,32], index: 2, kind: input, shape index: {}]   ;;  %s2138_s3 = inlined_call_operand.vmem [shape: f32[2,96,32], index: 3, kind: input, shape index: {}]   ;;  %s2139_s4 = inlined_call_operand.vmem [shape: f32[16,32], index: 4, kind: input, shape index: {}]   ;;  %s2140_s5 = inlined_call_operand.hbm [shape: f32[2,16,32], index: 5, kind: output, shape index: {}, may-alias: {0,5}]  }
   0x1   :  { %11 = vsyncpa [#allocation5], 0  ;;  %s1562_s18 = smov [#allocation3]   ;;  %s1514_s22 = scalar_lea.hbm %s2135_s0, 512 }
   0x2   :  { %s17_s19 = sshll.u32 %s1562_s18, 4  ;;  %p1515_p0 = scmp.ne.s32.totalorder %s2135_s0, %s1514_s22  ;;  %s18_s19 = int_to_ptr.vmem [resolvable:$true] %s17_s19 }
   0x3   :  { %p1518_p1 = scmp.lt.u32.totalorder %s1514_s22, %s2135_s0 }
   0x5   :  { %p1520_p2 = pnand %p1518_p1, %p1515_p0 }
   0x7   :  { %1523 = shalt.err (!%p1520_p2)
}
   0x8   :  { %s1524_s27 = scalar_lea.vmem %s18_s19, 512  ;;  %p1529_p4 = scmp.lt.s32.totalorder %s18_s19, %s18_s19 }
   0x9   :  { %p1525_p3 = scmp.ne.s32.totalorder %s18_s19, %s1524_s27  ;;  %p1530_p5 = scmp.lt.s32.totalorder %s1524_s27, %s1524_s27 }
   0xb   :  { %p1531_p6 = por %p1530_p5, %p1529_p4 }
   0xd   :  { %p1532_p7 = pnand %p1531_p6, %p1525_p3 }
   0xf   :  { %1535 = shalt.err (!%p1532_p7)
}
  0x10   :  { %s1563_s28 = smov 128   ;;  %s1564_s29 = smov 8  }
  0x11   :  { %23 = dma.hbm_to_vmem [thread:$0]  %s2135_s0, 512, %s18_s19, [#allocation4], %s1563_s28, %s1563_s28, %s1564_s29  }
  0x12   :  { %1558 = dma.done.wait [#allocation4], 512  }
  0x13   :  { %1559 = vsyncadd [#allocation4], 4294966784  ;;  %v46_v0 = vlaneseq  ;;  %vm2141_vm0 = vcmask 261120   ;;  %v1617_v1 = vld [vmem:[#allocation3] sm:$0xff]  ;;  %v1619_v2 = vld [vmem:[#allocation3 + $0x8] sm:$0xff]  ;;  %v2146_v20 = vmov 0 }
  0x14   :  { %v1621_v3 = vld [vmem:[#allocation3 + $0x10] sm:$0xff]  ;;  %v1623_v4 = vld [vmem:[#allocation3 + $0x18] sm:$0xff]  ;;  %v89_v5 = vsel %vm2141_vm0, %v1617_v1, 0.0  ;;  %v90_v6 = vsel %vm2141_vm0, %v1619_v2, 0.0  ;;  %v1565_v26 = vmov 0.0   ;;  %s1569_s11 = smov 32  }
  0x15   :  { %v98_v7 = vsel %vm2141_vm0, %v1621_v3, 0.0  ;;  %v47_v8 = vand.u32 127, %v46_v0  ;;  %v91_v9 = vadd.f32 %v90_v6, %v89_v5  ;;  %v99_v10 = vsel %vm2141_vm0, %v1623_v4, 0.0  ;;  %s1570_s12 = smov 64  }
  0x16   :  { %v100_v11 = vadd.f32 %v99_v10, %v98_v7 }
  0x17   :  { %v92_v12 = vrot.slane %v91_v9, 4  ;;  %vm58_vm1 = vcmp.ge.s32.totalorder %v47_v8, 8  ;;  %vm59_vm2 = vcmp.lt.s32.totalorder %v47_v8, 12  ;;  %vm53_vm3 = vcmp.ge.s32.totalorder %v47_v8, 4 }
  0x18   :  { %v101_v13 = vrot.slane %v100_v11, 4  ;;  %vm54_vm4 = vcmp.lt.s32.totalorder %v47_v8, 8  ;;  %vm63_vm5 = vcmp.ge.s32.totalorder %v47_v8, 12  ;;  %vm64_vm6 = vcmp.lt.s32.totalorder %v47_v8, 16  ;;  %vm1634_vm7 = vmand %vm58_vm1, %vm59_vm2 }
  0x19   :  { %v93_v14 = vadd.f32 %v92_v12, %v91_v9  ;;  %vm68_vm8 = vcmp.ge.s32.totalorder %v47_v8, 16  ;;  %vm69_vm9 = vcmp.lt.s32.totalorder %v47_v8, 20  ;;  %vm1638_vm10 = vmand %vm53_vm3, %vm54_vm4  ;;  %vm73_vm11 = vcmp.ge.s32.totalorder %v47_v8, 20 }
  0x1a   :  { %v102_v15 = vadd.f32 %v101_v13, %v100_v11  ;;  %vm74_vm12 = vcmp.lt.s32.totalorder %v47_v8, 24  ;;  %vm1642_vm13 = vmand %vm63_vm5, %vm64_vm6  ;;  %vm78_vm14 = vcmp.ge.s32.totalorder %v47_v8, 24  ;;  %vm79_vm15 = vcmp.lt.s32.totalorder %v47_v8, 28 }
  0x1b   :  { %v94_v17 = vrot.slane %v93_v14, 2  ;;  %v2147_v20 = vsel %vm1642_vm13, 4294967295, %v2146_v20  ;;  %vm49_vm1 = vcmp.lt.s32.totalorder %v47_v8, 4  ;;  %vm1646_vm2 = vmand %vm68_vm8, %vm69_vm9  ;;  %vm83_vm0 = vcmp.ge.s32.totalorder %v47_v8, 28 }
  0x1c   :  { %v103_v19 = vrot.slane %v102_v15, 2  ;;  %vm1650_vm3 = vmand %vm73_vm11, %vm74_vm12  ;;  %vm84_vm5 = vcmp.lt.s32.totalorder %v47_v8, 32  ;;  %v1655_v27 = vsel %vm49_vm1, 1.0, %v1565_v26  ;;  %vm112_vm6 = vcmask 1041409  }
  0x1d   :  { %v95_v21 = vadd.f32 %v94_v17, %v93_v14  ;;  %vm80_vm4 = vmand %vm78_vm14, %vm79_vm15  ;;  %vm115_vm13 = vcmask 254976   ;;  %v1660_v30 = vsel %vm1634_vm7, 1.0, %v1565_v26  ;;  %v1665_v31 = vsel %vm1638_vm10, 1.0, %v1565_v26 }
  0x1e   :  { %v104_v23 = vadd.f32 %v103_v19, %v102_v15  ;;  %vm2152_vm8 = vnez %v2147_v20  ;;  %v1675_v34 = vsel %vm1646_vm2, 1.0, %v1565_v26  ;;  %v1680_v35 = vsel %vm1650_vm3, 1.0, %v1565_v26  ;;  %vm85_vm7 = vmand %vm83_vm0, %vm84_vm5 }
  0x1f   :  { %v96_v25 = vrot.slane %v95_v21, 1  ;;  %v1670_v32 = vsel %vm2152_vm8, 1.0, %v1565_v26  ;;  %v1683_v36 = vsel %vm80_vm4, 1.0, %v1565_v26  ;;  %v1698_v48 = vsel %vm85_vm7, 1.0, %v1565_v26 }
  0x20   :  { %v105_v28 = vrot.slane %v104_v23, 1  ;;  %vm2153_vm0 = vcmask 261120   ;;  %vm42_vm12 = vcmask 778752   ;;  %vm40_vm14 = vcmask 253952  }
  0x21   :  { %v97_v29 = vadd.f32 %v96_v25, %v95_v21  ;;  %vm2154_vm9 = vmmov %vm2153_vm0  ;;  %43 = vst.msk [vmem:[#allocation2 + $0xf] sm:$0x1] %vm42_vm12, %v1565_v26  ;;  %vm458_vm15 = vcmask 260096   ;;  %vm1568_vm1 = vmmov 0   ;;  %vm621_vm3 = vcmask 130048  }
  0x22   :  { %v106_v33 = vadd.f32 %v105_v28, %v104_v23  ;;  %vm2155_vm10 = vmmov %vm2153_vm0  ;;  %45 = vst.msk [vmem:[#allocation2 + $0x1f] sm:$0x1] %vm42_vm12, %v1565_v26  ;;  %1376 = vmatprep.mubr.msk.f32.mxu1 %vm1568_vm1, %v1565_v26  ;;  %vm468_vm5 = vcmask 523520   ;;  %vm477_vm8 = vcmask 785921   ;;  %vm479_vm7 = vcmask 785920  }
  0x23   :  { %v107_v37 = vmul.f32 %v1655_v27, %v97_v29  ;;  %v133_v38 = vmul.f32 %v1660_v30, %v97_v29  ;;  %v121_v39 = vmul.f32 %v1665_v31, %v97_v29  ;;  %v145_v40 = vmul.f32 %v1670_v32, %v97_v29  ;;  %vm2156_vm11 = vmmov %vm2153_vm0  ;;  %41 = vst.msk [vmem:[#allocation2] sm:$0x1] %vm40_vm14, %v1565_v26 }
  0x24   :  { %v108_v41 = vmul.f32 %v1655_v27, %v106_v33  ;;  %v134_v42 = vmul.f32 %v1660_v30, %v106_v33  ;;  %v122_v43 = vmul.f32 %v1665_v31, %v106_v33  ;;  %v146_v44 = vmul.f32 %v1670_v32, %v106_v33  ;;  %44 = vst.msk [vmem:[#allocation2 + $0x10] sm:$0x1] %vm40_vm14, %v1565_v26  ;;  %vm2157_vm2 = vmmov %vm2153_vm0 }
  0x25   :  { %v157_v45 = vmul.f32 %v1675_v34, %v97_v29  ;;  %v158_v46 = vmul.f32 %v1675_v34, %v106_v33  ;;  %v170_v47 = vmul.f32 %v1680_v35, %v106_v33  ;;  %v169_v54 = vmul.f32 %v1680_v35, %v97_v29  ;;  %vm2158_vm4 = vmmov %vm2153_vm0 }
  0x26   :  { %v111_v49 = vrot.slane %v108_v41, 7  ;;  %v137_v50 = vrot.slane %v134_v42, 7  ;;  %v125_v51 = vrot.slane %v122_v43, 7  ;;  %v149_v52 = vrot.slane %v146_v44, 7  ;;  %vm2162_vm12 = vmmov %vm2157_vm2 }
  0x27   :  { %v161_v53 = vrot.slane %v158_v46, 7  ;;  %v173_v55 = vrot.slane %v170_v47, 7  ;;  %v182_v56 = vmul.f32 %v1683_v36, %v106_v33  ;;  %v181_v6 = vmul.f32 %v1683_v36, %v97_v29  ;;  %vm2163_vm14 = vmmov %vm2157_vm2 }
  0x28   :  { %v113_v57 = vsel %vm112_vm6, %v111_v49, %v107_v37  ;;  %v138_v58 = vsel %vm112_vm6, %v137_v50, %v133_v38  ;;  %v126_v59 = vsel %vm112_vm6, %v125_v51, %v121_v39  ;;  %v150_v60 = vsel %vm112_vm6, %v149_v52, %v145_v40  ;;  %vm2164_vm1 = vmmov %vm2157_vm2 }
  0x29   :  { %v116_v61 = vsel %vm115_vm13, %v113_v57, 0.0  ;;  %v140_v62 = vsel %vm115_vm13, %v138_v58, 0.0  ;;  %v128_v63 = vsel %vm115_vm13, %v126_v59, 0.0  ;;  %v152_v5 = vsel %vm115_vm13, %v150_v60, 0.0 }
  0x2a   :  { %117 = vadd.xlane.f32.xlu0 %v116_v61  ;;  %141 = vadd.xlane.f32.xlu1 %v140_v62  ;;  %v194_v7 = vmul.f32 %v1698_v48, %v106_v33  ;;  %v162_v8 = vsel %vm112_vm6, %v161_v53, %v157_v45  ;;  %v174_v9 = vsel %vm112_vm6, %v173_v55, %v169_v54  ;;  %v185_v10 = vrot.slane %v182_v56, 7 }
  0x2b   :  { %v193_v11 = vmul.f32 %v1698_v48, %v97_v29  ;;  %v164_v13 = vsel %vm115_vm13, %v162_v8, 0.0  ;;  %v176_v14 = vsel %vm115_vm13, %v174_v9, 0.0  ;;  %v1566_v42 = vmov 1966171168  }
  0x2c   :  { %v197_v12 = vrot.slane %v194_v7, 7  ;;  %v186_v15 = vsel %vm112_vm6, %v185_v10, %v181_v6  ;;  %v208_v43 = vunpack.c.l.s4 %v1566_v42  ;;  %v1729_v51 = vshrl.u32 %v46_v0, 7 }
  0x2d   :  { %v188_v17 = vsel %vm115_vm13, %v186_v15, 0.0 }
  0x2e   :  { %129 = vadd.xlane.f32.xlu0 %v128_v63  ;;  %153 = vadd.xlane.f32.xlu1 %v152_v5  ;;  %v198_v16 = vsel %vm112_vm6, %v197_v12, %v193_v11  ;;  %v209_v50 = vunpack.c.0.s8 %v208_v43  ;;  %v1736_v57 = vsub.s32 0, %v1729_v51 }
  0x2f   :  { %v200_v18 = vsel %vm115_vm13, %v198_v16, 0.0 }
  0x30   :  { %v1733_v54 = vsub.s32 %v209_v50, %v1729_v51 }
  0x32   :  { %165 = vadd.xlane.f32.xlu0 %v164_v13  ;;  %177 = vadd.xlane.f32.xlu1 %v176_v14 }
  0x36   :  { %189 = vadd.xlane.f32.xlu0 %v188_v17  ;;  %201 = vadd.xlane.f32.xlu1 %v200_v18 }
  0xb7   :  { %v118_v19 = vpop.xlane.xlu0 %117  ;;  %v142_v20 = vpop.xlane.xlu1 %141 }
  0xb8   :  { %v119_v23 = vmul.f32 %v1655_v27, %v118_v19  ;;  %v143_v25 = vmul.f32 %v1660_v30, %v142_v20 }
  0xbb   :  { %v130_v21 = vpop.xlane.xlu0 %129  ;;  %v154_v22 = vpop.xlane.xlu1 %153 }
  0xbc   :  { %v131_v24 = vmul.f32 %v1665_v31, %v130_v21  ;;  %v155_v29 = vmul.f32 %v1670_v32, %v154_v22 }
  0xbe   :  { %v132_v28 = vadd.f32 %v131_v24, %v119_v23 }
  0xbf   :  { %v166_v33 = vpop.xlane.xlu0 %165  ;;  %v178_v37 = vpop.xlane.xlu1 %177 }
  0xc0   :  { %v144_v38 = vadd.f32 %v143_v25, %v132_v28  ;;  %v167_v39 = vmul.f32 %v1675_v34, %v166_v33  ;;  %v179_v41 = vmul.f32 %v1680_v35, %v178_v37 }
  0xc2   :  { %v156_v40 = vadd.f32 %v155_v29, %v144_v38 }
  0xc3   :  { %v190_v44 = vpop.xlane.xlu0 %189  ;;  %v202_v45 = vpop.xlane.xlu1 %201 }
  0xc4   :  { %v168_v46 = vadd.f32 %v167_v39, %v156_v40  ;;  %v191_v47 = vmul.f32 %v1683_v36, %v190_v44  ;;  %v203_v52 = vmul.f32 %v1698_v48, %v202_v45 }
  0xc6   :  { %v180_v49 = vadd.f32 %v179_v41, %v168_v46 }
  0xc8   :  { %v192_v53 = vadd.f32 %v191_v47, %v180_v49 }
  0xca   :  { %v204_v55 = vadd.f32 %v203_v52, %v192_v53 }
  0xcc   :  { %v205_v56 = vmul.f32 0.015625, %v204_v55 }
  0xce   :  { %v213_v58 = vrot.slane %v205_v56, %v1733_v54 }
  0xd0   :  { %v214_v59 = vcombine.high %v213_v58, %v213_v58  ;;  %v221_v60 = vrot.slane %v213_v58, %v1733_v54 }
  0xd2   :  { %v228_v61 = vrot.slane %v214_v59, %v1733_v54  ;;  %v232_v0 = vrot.slane %v221_v60, %v1736_v57 }
  0xd4   :  { %v236_v62 = vrot.slane %v228_v61, %v1736_v57  ;;  %v1744_v63 = vsub.f32 %v1617_v1, %v232_v0  ;;  %v1747_v5 = vsub.f32 %v1619_v2, %v232_v0 }
  0xd6   :  { %v1750_v6 = vsub.f32 %v1621_v3, %v236_v62  ;;  %v1753_v7 = vsub.f32 %v1623_v4, %v236_v62  ;;  %v243_v8 = vmul.f32 %v1744_v63, %v1744_v63  ;;  %v244_v9 = vmul.f32 %v1747_v5, %v1747_v5 }
  0xd8   :  { %v245_v10 = vmul.f32 %v1750_v6, %v1750_v6  ;;  %v246_v1 = vmul.f32 %v1753_v7, %v1753_v7  ;;  %v247_v2 = vsel %vm2153_vm0, %v243_v8, 0.0  ;;  %v248_v3 = vsel %vm2154_vm9, %v244_v9, 0.0  ;;  %vm2159_vm9 = vmmov %vm2157_vm2 }
  0xd9   :  { %v249_v11 = vadd.f32 %v248_v3, %v247_v2  ;;  %vm509_vm0 = vcmask 785408  }
  0xda   :  { %v256_v4 = vsel %vm2155_vm10, %v245_v10, 0.0  ;;  %v257_v12 = vsel %vm2156_vm11, %v246_v1, 0.0  ;;  %vm2160_vm10 = vmmov %vm2157_vm2 }
  0xdb   :  { %v250_v13 = vrot.slane %v249_v11, 4  ;;  %v258_v14 = vadd.f32 %v257_v12, %v256_v4  ;;  %vm2161_vm11 = vmmov %vm2157_vm2 }
  0xdd   :  { %v251_v15 = vadd.f32 %v250_v13, %v249_v11  ;;  %v259_v16 = vrot.slane %v258_v14, 4 }
  0xdf   :  { %v252_v17 = vrot.slane %v251_v15, 2  ;;  %v260_v18 = vadd.f32 %v259_v16, %v258_v14 }
  0xe1   :  { %v253_v19 = vadd.f32 %v252_v17, %v251_v15  ;;  %v261_v20 = vrot.slane %v260_v18, 2 }
  0xe3   :  { %v254_v21 = vrot.slane %v253_v19, 1  ;;  %v262_v22 = vadd.f32 %v261_v20, %v260_v18  ;;  %v445_v18 = vld [vmem:[%s2138_s3] sm:$0xff]  ;;  %v447_v20 = vld [vmem:[%s2138_s3 + $0x10] sm:$0xff] }
  0xe5   :  { %v263_v23 = vrot.slane %v262_v22, 1  ;;  %v255_v24 = vadd.f32 %v254_v21, %v253_v19  ;;  %v446_v19 = vld [vmem:[%s2138_s3 + $0x8] sm:$0xff] }
  0xe6   :  { %v1409_v21 = vpack.c.bf16 %v446_v19, %v445_v18 }
  0xe7   :  { %v264_v25 = vadd.f32 %v263_v23, %v262_v22  ;;  %v277_v38 = vmul.f32 %v1665_v31, %v255_v24  ;;  %v265_v39 = vmul.f32 %v1655_v27, %v255_v24  ;;  %v301_v49 = vmul.f32 %v1670_v32, %v255_v24  ;;  %v448_v22 = vld [vmem:[%s2138_s3 + $0x18] sm:$0xff] }
  0xe8   :  { %v289_v50 = vmul.f32 %v1660_v30, %v255_v24  ;;  %v325_v0 = vmul.f32 %v1680_v35, %v255_v24  ;;  %v313_v62 = vmul.f32 %v1675_v34, %v255_v24  ;;  %v349_v11 = vmul.f32 %v1698_v48, %v255_v24  ;;  %1410 = vmatprep.subr.bf16.mxu0 %v1409_v21 }
  0xe9   :  { %v278_v28 = vmul.f32 %v1665_v31, %v264_v25  ;;  %v266_v29 = vmul.f32 %v1655_v27, %v264_v25  ;;  %v302_v33 = vmul.f32 %v1670_v32, %v264_v25  ;;  %v290_v37 = vmul.f32 %v1660_v30, %v264_v25  ;;  %1412 = vmatpush3.bf16.msra.mxu0 %v1409_v21 }
  0xea   :  { %v326_v40 = vmul.f32 %v1680_v35, %v264_v25  ;;  %v314_v41 = vmul.f32 %v1675_v34, %v264_v25  ;;  %v350_v56 = vmul.f32 %v1698_v48, %v264_v25  ;;  %v338_v61 = vmul.f32 %v1683_v36, %v264_v25 }
  0xeb   :  { %v281_v42 = vrot.slane %v278_v28, 7  ;;  %v269_v43 = vrot.slane %v266_v29, 7  ;;  %v305_v44 = vrot.slane %v302_v33, 7  ;;  %v293_v45 = vrot.slane %v290_v37, 7 }
  0xec   :  { %v329_v55 = vrot.slane %v326_v40, 7  ;;  %v317_v60 = vrot.slane %v314_v41, 7  ;;  %v353_v2 = vrot.slane %v350_v56, 7  ;;  %v341_v3 = vrot.slane %v338_v61, 7 }
  0xed   :  { %v282_v46 = vsel %vm112_vm6, %v281_v42, %v277_v38  ;;  %v270_v47 = vsel %vm112_vm6, %v269_v43, %v265_v39  ;;  %v306_v58 = vsel %vm112_vm6, %v305_v44, %v301_v49  ;;  %v294_v59 = vsel %vm112_vm6, %v293_v45, %v289_v50 }
  0xee   :  { %v284_v52 = vsel %vm115_vm13, %v282_v46, 0.0  ;;  %v272_v53 = vsel %vm115_vm13, %v270_v47, 0.0  ;;  %v308_v8 = vsel %vm115_vm13, %v306_v58, 0.0  ;;  %v296_v9 = vsel %vm115_vm13, %v294_v59, 0.0 }
  0xef   :  { %285 = vadd.xlane.f32.xlu1 %v284_v52  ;;  %273 = vadd.xlane.f32.xlu0 %v272_v53  ;;  %v330_v10 = vsel %vm112_vm6, %v329_v55, %v325_v0  ;;  %v318_v1 = vsel %vm112_vm6, %v317_v60, %v313_v62  ;;  %v337_v4 = vmul.f32 %v1683_v36, %v255_v24  ;;  %v1825_v62 = vld [vmem:[%s2137_s2] sm:$0xff] }
  0xf0   :  { %v332_v12 = vsel %vm115_vm13, %v330_v10, 0.0  ;;  %v320_v13 = vsel %vm115_vm13, %v318_v1, 0.0  ;;  %v354_v14 = vsel %vm112_vm6, %v353_v2, %v349_v11  ;;  %v1413_v23 = vpack.c.bf16 %v448_v22, %v447_v20 }
  0xf1   :  { %v342_v15 = vsel %vm112_vm6, %v341_v3, %v337_v4  ;;  %v356_v16 = vsel %vm115_vm13, %v354_v14, 0.0  ;;  %v404_v2 = vrot.slane %v1825_v62, %v1736_v57 }
  0xf2   :  { %v344_v17 = vsel %vm115_vm13, %v342_v15, 0.0  ;;  %1414 = vmatprep.subr.bf16.mxu0 %v1413_v23 }
  0xf3   :  { %309 = vadd.xlane.f32.xlu1 %v308_v8  ;;  %297 = vadd.xlane.f32.xlu0 %v296_v9  ;;  %v411_v9 = vsub.s32 1, %v1729_v51 }
  0xf4   :  { %1416 = vmatpush3.bf16.msra.mxu0 %v1413_v23 }
  0xf5   :  { %v412_v4 = vrot.slane %v1825_v62, %v411_v9 }
  0xf7   :  { %333 = vadd.xlane.f32.xlu1 %v332_v12  ;;  %321 = vadd.xlane.f32.xlu0 %v320_v13 }
  0xfb   :  { %357 = vadd.xlane.f32.xlu1 %v356_v16  ;;  %345 = vadd.xlane.f32.xlu0 %v344_v17 }
 0x17c   :  { %v286_v24 = vpop.xlane.xlu1 %285  ;;  %v274_v25 = vpop.xlane.xlu0 %273 }
 0x17d   :  { %v287_v28 = vmul.f32 %v1665_v31, %v286_v24  ;;  %v275_v29 = vmul.f32 %v1655_v27, %v274_v25 }
 0x17f   :  { %v288_v38 = vadd.f32 %v287_v28, %v275_v29 }
 0x180   :  { %v310_v33 = vpop.xlane.xlu1 %309  ;;  %v298_v37 = vpop.xlane.xlu0 %297 }
 0x181   :  { %v299_v39 = vmul.f32 %v1660_v30, %v298_v37  ;;  %v311_v40 = vmul.f32 %v1670_v32, %v310_v33 }
 0x183   :  { %v300_v41 = vadd.f32 %v299_v39, %v288_v38 }
 0x184   :  { %v334_v42 = vpop.xlane.xlu1 %333  ;;  %v322_v43 = vpop.xlane.xlu0 %321 }
 0x185   :  { %v312_v44 = vadd.f32 %v311_v40, %v300_v41  ;;  %v323_v45 = vmul.f32 %v1675_v34, %v322_v43  ;;  %v335_v46 = vmul.f32 %v1680_v35, %v334_v42  ;;  %v449_v43 = vld [vmem:[%s2138_s3 + $0x20] sm:$0xff] }
 0x187   :  { %v324_v47 = vadd.f32 %v323_v45, %v312_v44  ;;  %v450_v44 = vld [vmem:[%s2138_s3 + $0x28] sm:$0xff] }
 0x188   :  { %v358_v49 = vpop.xlane.xlu1 %357  ;;  %v346_v50 = vpop.xlane.xlu0 %345  ;;  %v1417_v45 = vpack.c.bf16 %v450_v44, %v449_v43 }
 0x189   :  { %v336_v52 = vadd.f32 %v335_v46, %v324_v47  ;;  %v347_v53 = vmul.f32 %v1683_v36, %v346_v50  ;;  %v359_v55 = vmul.f32 %v1698_v48, %v358_v49  ;;  %v451_v47 = vld [vmem:[%s2138_s3 + $0x30] sm:$0xff]  ;;  %v452_v49 = vld [vmem:[%s2138_s3 + $0x38] sm:$0xff] }
 0x18a   :  { %1418 = vmatprep.subr.bf16.mxu0 %v1417_v45  ;;  %v1421_v50 = vpack.c.bf16 %v452_v49, %v451_v47 }
 0x18b   :  { %v348_v56 = vadd.f32 %v347_v53, %v336_v52  ;;  %1420 = vmatpush3.bf16.msra.mxu0 %v1417_v45  ;;  %v1567_v52 = vmov 0.0|0.0   ;;  %v615_v53 = vld [vmem:[%s2139_s4] sm:$0xff] }
 0x18c   :  { %1433 = vmatprep.subr.bf16.mxu1 %v1567_v52  ;;  %1422 = vmatprep.subr.bf16.mxu0 %v1421_v50 }
 0x18d   :  { %v360_v58 = vadd.f32 %v359_v55, %v348_v56  ;;  %v616_v55 = vld [vmem:[%s2139_s4 + $0x8] sm:$0xff]  ;;  %v453_v56 = vld [vmem:[%s2138_s3 + $0x40] sm:$0xff] }
 0x18f   :  { %v361_v59 = vmul.f32 0.015625, %v360_v58  ;;  %1424 = vmatpush3.bf16.msra.mxu0 %v1421_v50 }
 0x191   :  { %v362_v60 = vadd.f32 1e-06, %v361_v59  ;;  %v1434_v59 = vpack.c.bf16 %v616_v55, %v615_v53 }
 0x193   :  { %1470 = vrsqrt.f32 %v362_v60  ;;  %v454_v60 = vld [vmem:[%s2138_s3 + $0x48] sm:$0xff]  ;;  %1435 = vmatpush3.bf16.msra.mxu1 %v1434_v59 }
 0x19d   :  { %v1471_v61 = vpop.eup %1470 }
 0x19e   :  { %v371_v0 = vrot.slane %v1471_v61, %v1733_v54 }
 0x1a0   :  { %v379_v8 = vrot.slane %v371_v0, %v1733_v54  ;;  %v372_v10 = vcombine.high %v371_v0, %v371_v0 }
 0x1a2   :  { %v390_v1 = vrot.slane %v379_v8, %v1736_v57  ;;  %v386_v3 = vrot.slane %v372_v10, %v1733_v54  ;;  %v1425_v8 = vpack.c.bf16 %v454_v60, %v453_v56 }
 0x1a4   :  { %v398_v11 = vmul.f32 %v390_v1, %v1747_v5  ;;  %v397_v12 = vmul.f32 %v390_v1, %v1744_v63  ;;  %v394_v13 = vrot.slane %v386_v3, %v1736_v57  ;;  %v1844_v63 = vld [vmem:[%s2136_s1] sm:$0x3]  ;;  %v455_v1 = vld [vmem:[%s2138_s3 + $0x50] sm:$0xff]  ;;  %1426 = vmatprep.subr.bf16.mxu0 %v1425_v8 }
 0x1a5   :  { %1428 = vmatpush3.bf16.msra.mxu0 %v1425_v8 }
 0x1a6   :  { %v406_v14 = vmul.f32 %v404_v2, %v398_v11  ;;  %v405_v15 = vmul.f32 %v404_v2, %v397_v12  ;;  %v399_v16 = vmul.f32 %v394_v13, %v1750_v6  ;;  %v400_v17 = vmul.f32 %v394_v13, %v1753_v7 }
 0x1a7   :  { %v1285_v7 = vmul.f32 -1.442695, %v1844_v63 }
 0x1a8   :  { %v414_v18 = vadd.f32 %v412_v4, %v406_v14  ;;  %v413_v19 = vadd.f32 %v412_v4, %v405_v15  ;;  %v407_v20 = vmul.f32 %v404_v2, %v399_v16  ;;  %v408_v21 = vmul.f32 %v404_v2, %v400_v17  ;;  %v456_v2 = vld [vmem:[%s2138_s3 + $0x58] sm:$0xff] }
 0x1a9   :  { %v1429_v26 = vpack.c.bf16 %v456_v2, %v455_v1 }
 0x1aa   :  { %v1278_v22 = vmul.f32 -1.442695, %v414_v18  ;;  %v1277_v23 = vmul.f32 -1.442695, %v413_v19  ;;  %v415_v24 = vadd.f32 %v412_v4, %v407_v20  ;;  %v1839_v5 = vadd.f32 %v412_v4, %v408_v21 }
 0x1ab   :  { %1430 = vmatprep.subr.bf16.mxu0 %v1429_v26 }
 0x1ac   :  { %1472 = vpow2.f32 %v1278_v22  ;;  %v1279_v25 = vmul.f32 -1.442695, %v415_v24  ;;  %v1280_v6 = vmul.f32 -1.442695, %v1839_v5  ;;  %1432 = vmatpush3.bf16.msra.mxu0 %v1429_v26 }
 0x1ad   :  { %1474 = vpow2.f32 %v1277_v23 }
 0x1ae   :  { %1476 = vpow2.f32 %v1279_v25 }
 0x1af   :  { %1478 = vpow2.f32 %v1280_v6  ;;  %v619_v6 = vsub.s32 3, %v1729_v51 }
 0x1b0   :  { %1480 = vpow2.f32 %v1285_v7 }
 0x1b1   :  { %v620_v7 = vrot.slane %v1825_v62, %v619_v6 }
 0x1b6   :  { %v1473_v28 = vpop.eup %1472 }
 0x1b7   :  { %v1475_v29 = vpop.eup %1474  ;;  %v430_v33 = vadd.f32 1.0, %v1473_v28 }
 0x1b8   :  { %v1477_v37 = vpop.eup %1476  ;;  %v429_v38 = vadd.f32 1.0, %v1475_v29 }
 0x1b9   :  { %v1479_v39 = vpop.eup %1478  ;;  %1482 = vrcp.f32 %v430_v33  ;;  %v431_v40 = vadd.f32 1.0, %v1477_v37  ;;  %v507_v33 = vsub.s32 2, %v1729_v51 }
 0x1ba   :  { %v1481_v41 = vpop.eup %1480  ;;  %1484 = vrcp.f32 %v429_v38  ;;  %v432_v42 = vadd.f32 1.0, %v1479_v39 }
 0x1bb   :  { %1486 = vrcp.f32 %v431_v40  ;;  %v611_v46 = vadd.f32 1.0, %v1481_v41  ;;  %v508_v38 = vrot.slane %v1825_v62, %v507_v33 }
 0x1bc   :  { %1488 = vrcp.f32 %v432_v42 }
 0x1bd   :  { %1490 = vrcp.f32 %v611_v46 }
 0x1c3   :  { %v1483_v58 = vpop.eup %1482 }
 0x1c4   :  { %v1485_v61 = vpop.eup %1484  ;;  %v442_v0 = vmul.f32 %v1483_v58, %v414_v18 }
 0x1c5   :  { %v1487_v9 = vpop.eup %1486  ;;  %v441_v10 = vmul.f32 %v1485_v61, %v413_v19 }
 0x1c6   :  { %v1489_v3 = vpop.eup %1488  ;;  %464 = vrot.lane.b32.xlu1 %v442_v0, %s1569_s11  ;;  %v443_v11 = vmul.f32 %v1487_v9, %v415_v24  ;;  %459 = vst.msk [vmem:[#allocation2 + $0x9] sm:$0x7f] %vm458_vm15, %v442_v0 }
 0x1c7   :  { %v1491_v4 = vpop.eup %1490  ;;  %462 = vrot.lane.b32.xlu0 %v441_v10, %s1569_s11  ;;  %457 = vst.msk [vmem:[#allocation2 + $0x1] sm:$0xff] %vm2157_vm2, %v441_v10  ;;  %v444_v12 = vmul.f32 %v1489_v3, %v1839_v5  ;;  %vm2165_vm2 = vmmov %vm2164_vm1 }
 0x1c8   :  { %481 = vst.msk [vmem:[#allocation2 + $0x11] sm:$0xff] %vm2158_vm4, %v443_v11  ;;  %v614_v13 = vmul.f32 %v1491_v4, %v1844_v63  ;;  %vm2170_vm4 = vmmov %vm2164_vm1 }
 0x1c9   :  { %482 = vst.msk [vmem:[#allocation2 + $0x19] sm:$0x7f] %vm458_vm15, %v444_v12 }
 0x1ca   :  { %471 = vrot.lane.b32.xlu1 %v441_v10, %s1570_s12  ;;  %1377 = vmatmul.mubr.msk.f32.vlgmr.msra.gmra.mrb[0].mxu1 %vm621_vm3, %v614_v13  ;;  %vm2166_vm3 = vmmov %vm2164_vm1 }
 0x1cb   :  { %485 = vrot.lane.b32.xlu0 %v443_v11, %s1569_s11 }
 0x1ce   :  { %473 = vrot.lane.b32.xlu1 %v442_v0, %s1570_s12 }
 0x1cf   :  { %493 = vrot.lane.b32.xlu0 %v443_v11, %s1570_s12 }
 0x1d2   :  { %487 = vrot.lane.b32.xlu1 %v444_v12, %s1569_s11 }
 0x1d6   :  { %495 = vrot.lane.b32.xlu1 %v444_v12, %s1570_s12 }
 0x238   :  { %v465_v14 = vpop.permute.xlu1 %464 }
 0x239   :  { %470 = vst.msk [vmem:[#allocation2 + $0x8] sm:$0xff] %vm468_vm5, %v465_v14  ;;  %v463_v15 = vpop.permute.xlu0 %462 }
 0x23a   :  { %469 = vst.msk [vmem:[#allocation2] sm:$0xff] %vm468_vm5, %v463_v15 }
 0x23c   :  { %v472_v16 = vpop.permute.xlu1 %471 }
 0x23d   :  { %478 = vst.msk [vmem:[#allocation2 - $0x1] sm:$0xfe] %vm477_vm8, %v472_v16  ;;  %v486_v17 = vpop.permute.xlu0 %485 }
 0x23e   :  { %491 = vst.msk [vmem:[#allocation2 + $0x10] sm:$0xff] %vm468_vm5, %v486_v17 }
 0x240   :  { %v474_v18 = vpop.permute.xlu1 %473 }
 0x241   :  { %480 = vst.msk [vmem:[#allocation2 + $0x7] sm:$0xff] %vm479_vm7, %v474_v18  ;;  %v494_v19 = vpop.permute.xlu0 %493 }
 0x242   :  { %499 = vst.msk [vmem:[#allocation2 + $0xf] sm:$0xfe] %vm477_vm8, %v494_v19 }
 0x244   :  { %v488_v20 = vpop.permute.xlu1 %487 }
 0x245   :  { %492 = vst.msk [vmem:[#allocation2 + $0x18] sm:$0xff] %vm468_vm5, %v488_v20 }
 0x248   :  { %v496_v21 = vpop.permute.xlu1 %495  ;;  %v501_v22 = vld [vmem:[#allocation2] sm:$0xff]  ;;  %v502_v23 = vld [vmem:[#allocation2 + $0x8] sm:$0xff] }
 0x249   :  { %500 = vst.msk [vmem:[#allocation2 + $0x17] sm:$0xff] %vm479_vm7, %v496_v21  ;;  %1366 = vmatprep.mubr.msk.f32.mxu0 %vm509_vm0, %v501_v22 }
 0x24a   :  { %1367 = vmatmul.mubr.msk.f32.vlgmr.msra.gmra.mrb[0].mxu0 %vm509_vm0, %v502_v23 }
 0x250   :  { %v503_v24 = vld [vmem:[#allocation2 + $0x10] sm:$0xff]  ;;  %v504_v5 = vld [vmem:[#allocation2 + $0x18] sm:$0xff] }
 0x251   :  { %1369 = vmatprep.mubr.msk.f32.mxu0 %vm509_vm0, %v503_v24 }
 0x252   :  { %1370 = vmatmul.mubr.msk.f32.gmra.mrb[2].mxu0 %vm509_vm0, %v504_v5 }
 0x29d   :  { %v691_v63 = vpop.f32.mrb[0].mxu1 }
 0x29e   :  { %v1378_v25 = vpop.f32.mrb[1].mxu1  ;;  %v692_v28 = vadd.f32 %v691_v63, %v620_v7 }
 0x2a0   :  { %v702_v29 = vrot.slane %v692_v28, %v1733_v54 }
 0x2a2   :  { %v710_v37 = vrot.slane %v702_v29, %v1733_v54  ;;  %v703_v39 = vcombine.high %v702_v29, %v702_v29 }
 0x2a4   :  { %v721_v40 = vrot.slane %v710_v37, %v1736_v57  ;;  %v717_v46 = vrot.slane %v703_v39, %v1733_v54 }
 0x2a6   :  { %v725_v53 = vrot.slane %v717_v46, %v1736_v57 }
 0x31d   :  { %v1368_v41 = vpop.f32.mrb[0].mxu0 }
 0x31e   :  { %v594_v42 = vadd.f32 %v1368_v41, %v508_v38  ;;  %v588_v43 = vpop.f32.mrb[1].mxu0 }
 0x31f   :  { %v589_v44 = vadd.f32 %v588_v43, %v508_v38 }
 0x320   :  { %v1914_v45 = vadd.f32 %v721_v40, %v594_v42 }
 0x321   :  { %v1917_v47 = vadd.f32 %v721_v40, %v589_v44 }
 0x322   :  { %v733_v49 = vsel %vm2159_vm9, %v1914_v45, 0.0 }
 0x323   :  { %v732_v50 = vsel %vm2160_vm10, %v1917_v47, 0.0 }
 0x324   :  { %v734_v52 = vadd.f32 %v733_v49, %v732_v50 }
 0x325   :  { %v1371_v55 = vpop.f32.mrb[2].mxu0 }
 0x326   :  { %v735_v56 = vrot.slane %v734_v52, 4  ;;  %v604_v58 = vadd.f32 %v1371_v55, %v508_v38  ;;  %v598_v59 = vpop.f32.mrb[3].mxu0 }
 0x327   :  { %v599_v60 = vadd.f32 %v598_v59, %v508_v38 }
 0x328   :  { %v736_v61 = vadd.f32 %v735_v56, %v734_v52  ;;  %v1924_v0 = vadd.f32 %v725_v53, %v604_v58 }
 0x329   :  { %v1926_v8 = vadd.f32 %v725_v53, %v599_v60 }
 0x32a   :  { %v742_v9 = vsel %vm2161_vm11, %v1924_v0, 0.0  ;;  %v737_v10 = vrot.slane %v736_v61, 2 }
 0x32b   :  { %v741_v1 = vsel %vm2162_vm12, %v1926_v8, 0.0 }
 0x32c   :  { %v743_v2 = vadd.f32 %v742_v9, %v741_v1  ;;  %v738_v11 = vadd.f32 %v737_v10, %v736_v61 }
 0x32e   :  { %v744_v3 = vrot.slane %v743_v2, 4  ;;  %v739_v12 = vrot.slane %v738_v11, 1 }
 0x330   :  { %v745_v26 = vadd.f32 %v744_v3, %v743_v2  ;;  %v740_v15 = vadd.f32 %v739_v12, %v738_v11 }
 0x332   :  { %v746_v4 = vrot.slane %v745_v26, 2  ;;  %v762_v21 = vmul.f32 %v1665_v31, %v740_v15  ;;  %v750_v22 = vmul.f32 %v1655_v27, %v740_v15  ;;  %v810_v29 = vmul.f32 %v1680_v35, %v740_v15 }
 0x333   :  { %v774_v33 = vmul.f32 %v1660_v30, %v740_v15  ;;  %v834_v44 = vmul.f32 %v1698_v48, %v740_v15  ;;  %v786_v46 = vmul.f32 %v1670_v32, %v740_v15  ;;  %v798_v58 = vmul.f32 %v1675_v34, %v740_v15 }
 0x334   :  { %v747_v13 = vadd.f32 %v746_v4, %v745_v26  ;;  %v822_v10 = vmul.f32 %v1683_v36, %v740_v15 }
 0x336   :  { %v748_v14 = vrot.slane %v747_v13, 1 }
 0x338   :  { %v749_v16 = vadd.f32 %v748_v14, %v747_v13 }
 0x33a   :  { %v763_v17 = vmul.f32 %v1665_v31, %v749_v16  ;;  %v751_v18 = vmul.f32 %v1655_v27, %v749_v16  ;;  %v811_v19 = vmul.f32 %v1680_v35, %v749_v16  ;;  %v775_v20 = vmul.f32 %v1660_v30, %v749_v16 }
 0x33b   :  { %v835_v23 = vmul.f32 %v1698_v48, %v749_v16  ;;  %v787_v24 = vmul.f32 %v1670_v32, %v749_v16  ;;  %v799_v39 = vmul.f32 %v1675_v34, %v749_v16  ;;  %v823_v56 = vmul.f32 %v1683_v36, %v749_v16 }
 0x33c   :  { %v766_v5 = vrot.slane %v763_v17, 7  ;;  %v754_v63 = vrot.slane %v751_v18, 7  ;;  %v814_v25 = vrot.slane %v811_v19, 7  ;;  %v778_v6 = vrot.slane %v775_v20, 7 }
 0x33d   :  { %v838_v42 = vrot.slane %v835_v23, 7  ;;  %v790_v43 = vrot.slane %v787_v24, 7  ;;  %v802_v55 = vrot.slane %v799_v39, 7  ;;  %v826_v9 = vrot.slane %v823_v56, 7 }
 0x33e   :  { %v767_v7 = vsel %vm112_vm6, %v766_v5, %v762_v21  ;;  %v755_v28 = vsel %vm112_vm6, %v754_v63, %v750_v22  ;;  %v815_v40 = vsel %vm112_vm6, %v814_v25, %v810_v29  ;;  %v779_v41 = vsel %vm112_vm6, %v778_v6, %v774_v33 }
 0x33f   :  { %v769_v37 = vsel %vm115_vm13, %v767_v7, 0.0  ;;  %v757_v38 = vsel %vm115_vm13, %v755_v28, 0.0  ;;  %v817_v49 = vsel %vm115_vm13, %v815_v40, 0.0  ;;  %v781_v50 = vsel %vm115_vm13, %v779_v41, 0.0 }
 0x340   :  { %770 = vadd.xlane.f32.xlu1 %v769_v37  ;;  %758 = vadd.xlane.f32.xlu0 %v757_v38  ;;  %v839_v52 = vsel %vm112_vm6, %v838_v42, %v834_v44  ;;  %v791_v53 = vsel %vm112_vm6, %v790_v43, %v786_v46  ;;  %v803_v61 = vsel %vm112_vm6, %v802_v55, %v798_v58 }
 0x341   :  { %v841_v59 = vsel %vm115_vm13, %v839_v52, 0.0  ;;  %v793_v60 = vsel %vm115_vm13, %v791_v53, 0.0  ;;  %v805_v1 = vsel %vm115_vm13, %v803_v61, 0.0  ;;  %v827_v2 = vsel %vm112_vm6, %v826_v9, %v822_v10 }
 0x342   :  { %v829_v3 = vsel %vm115_vm13, %v827_v2, 0.0 }
 0x344   :  { %818 = vadd.xlane.f32.xlu1 %v817_v49  ;;  %782 = vadd.xlane.f32.xlu0 %v781_v50 }
 0x348   :  { %842 = vadd.xlane.f32.xlu1 %v841_v59  ;;  %794 = vadd.xlane.f32.xlu0 %v793_v60 }
 0x34c   :  { %806 = vadd.xlane.f32.xlu0 %v805_v1 }
 0x350   :  { %830 = vadd.xlane.f32.xlu0 %v829_v3 }
 0x3cd   :  { %v759_v11 = vpop.xlane.xlu0 %758  ;;  %v771_v26 = vpop.xlane.xlu1 %770 }
 0x3ce   :  { %v772_v12 = vmul.f32 %v1665_v31, %v771_v26  ;;  %v760_v13 = vmul.f32 %v1655_v27, %v759_v11 }
 0x3d0   :  { %v773_v17 = vadd.f32 %v772_v12, %v760_v13 }
 0x3d1   :  { %v783_v4 = vpop.xlane.xlu0 %782  ;;  %v819_v18 = vpop.xlane.xlu1 %818 }
 0x3d2   :  { %v784_v14 = vmul.f32 %v1660_v30, %v783_v4  ;;  %v820_v23 = vmul.f32 %v1680_v35, %v819_v18 }
 0x3d4   :  { %v785_v19 = vadd.f32 %v784_v14, %v773_v17 }
 0x3d5   :  { %v795_v16 = vpop.xlane.xlu0 %794  ;;  %v843_v5 = vpop.xlane.xlu1 %842 }
 0x3d6   :  { %v796_v15 = vmul.f32 %v1670_v32, %v795_v16  ;;  %v844_v7 = vmul.f32 %v1698_v48, %v843_v5 }
 0x3d8   :  { %v797_v21 = vadd.f32 %v796_v15, %v785_v19 }
 0x3d9   :  { %v807_v20 = vpop.xlane.xlu0 %806 }
 0x3da   :  { %v808_v22 = vmul.f32 %v1675_v34, %v807_v20 }
 0x3dc   :  { %v809_v24 = vadd.f32 %v808_v22, %v797_v21 }
 0x3dd   :  { %v831_v63 = vpop.xlane.xlu0 %830 }
 0x3de   :  { %v821_v25 = vadd.f32 %v820_v23, %v809_v24  ;;  %v832_v6 = vmul.f32 %v1683_v36, %v831_v63 }
 0x3e0   :  { %v833_v28 = vadd.f32 %v832_v6, %v821_v25 }
 0x3e2   :  { %v845_v29 = vadd.f32 %v844_v7, %v833_v28 }
 0x3e4   :  { %v846_v33 = vmul.f32 0.015625, %v845_v29 }
 0x3e6   :  { %v854_v37 = vrot.slane %v846_v33, %v1733_v54 }
 0x3e8   :  { %v855_v38 = vcombine.high %v854_v37, %v854_v37  ;;  %v862_v39 = vrot.slane %v854_v37, %v1733_v54 }
 0x3ea   :  { %v869_v40 = vrot.slane %v855_v38, %v1733_v54  ;;  %v873_v41 = vrot.slane %v862_v39, %v1736_v57 }
 0x3ec   :  { %v877_v42 = vrot.slane %v869_v40, %v1736_v57  ;;  %v1978_v43 = vsub.f32 %v1917_v47, %v873_v41  ;;  %v1981_v44 = vsub.f32 %v1914_v45, %v873_v41 }
 0x3ee   :  { %v1984_v46 = vsub.f32 %v1926_v8, %v877_v42  ;;  %v1987_v49 = vsub.f32 %v1924_v0, %v877_v42  ;;  %v884_v50 = vmul.f32 %v1978_v43, %v1978_v43  ;;  %v885_v52 = vmul.f32 %v1981_v44, %v1981_v44 }
 0x3f0   :  { %v886_v53 = vmul.f32 %v1984_v46, %v1984_v46  ;;  %v887_v47 = vmul.f32 %v1987_v49, %v1987_v49  ;;  %v888_v45 = vsel %vm2163_vm14, %v884_v50, 0.0  ;;  %v889_v8 = vsel %vm2164_vm1, %v885_v52, 0.0 }
 0x3f1   :  { %v890_v55 = vadd.f32 %v889_v8, %v888_v45 }
 0x3f2   :  { %v897_v0 = vsel %vm2165_vm2, %v886_v53, 0.0  ;;  %v898_v56 = vsel %vm2166_vm3, %v887_v47, 0.0 }
 0x3f3   :  { %v891_v58 = vrot.slane %v890_v55, 4  ;;  %v899_v59 = vadd.f32 %v898_v56, %v897_v0 }
 0x3f5   :  { %v892_v60 = vadd.f32 %v891_v58, %v890_v55  ;;  %v900_v61 = vrot.slane %v899_v59, 4 }
 0x3f7   :  { %v893_v9 = vrot.slane %v892_v60, 2  ;;  %v901_v10 = vadd.f32 %v900_v61, %v899_v59 }
 0x3f9   :  { %v894_v1 = vadd.f32 %v893_v9, %v892_v60  ;;  %v902_v2 = vrot.slane %v901_v10, 2 }
 0x3fb   :  { %v895_v3 = vrot.slane %v894_v1, 1  ;;  %v903_v11 = vadd.f32 %v902_v2, %v901_v10  ;;  %v1291_v10 = vld [vmem:[%s2138_s3 + $0x60] sm:$0xff]  ;;  %v1293_v2 = vld [vmem:[%s2138_s3 + $0x70] sm:$0xff] }
 0x3fd   :  { %v904_v26 = vrot.slane %v903_v11, 1  ;;  %v896_v4 = vadd.f32 %v895_v3, %v894_v1  ;;  %v1292_v1 = vld [vmem:[%s2138_s3 + $0x68] sm:$0xff] }
 0x3fe   :  { %v1436_v3 = vpack.c.bf16 %v1292_v1, %v1291_v10 }
 0x3ff   :  { %v905_v12 = vadd.f32 %v904_v26, %v903_v11  ;;  %v918_v15 = vmul.f32 %v1665_v31, %v896_v4  ;;  %v906_v18 = vmul.f32 %v1655_v27, %v896_v4  ;;  %v942_v25 = vmul.f32 %v1670_v32, %v896_v4  ;;  %v1294_v11 = vld [vmem:[%s2138_s3 + $0x78] sm:$0xff] }
 0x400   :  { %v930_v6 = vmul.f32 %v1660_v30, %v896_v4  ;;  %v966_v41 = vmul.f32 %v1680_v35, %v896_v4  ;;  %v954_v42 = vmul.f32 %v1675_v34, %v896_v4  ;;  %v990_v55 = vmul.f32 %v1698_v48, %v896_v4  ;;  %1437 = vmatprep.subr.bf16.mxu1 %v1436_v3 }
 0x401   :  { %v919_v13 = vmul.f32 %v1665_v31, %v905_v12  ;;  %v907_v14 = vmul.f32 %v1655_v27, %v905_v12  ;;  %v943_v16 = vmul.f32 %v1670_v32, %v905_v12  ;;  %v931_v17 = vmul.f32 %v1660_v30, %v905_v12  ;;  %1439 = vmatpush3.bf16.msra.mxu1 %v1436_v3 }
 0x402   :  { %v967_v19 = vmul.f32 %v1680_v35, %v905_v12  ;;  %v955_v20 = vmul.f32 %v1675_v34, %v905_v12  ;;  %v991_v33 = vmul.f32 %v1698_v48, %v905_v12  ;;  %v979_v40 = vmul.f32 %v1683_v36, %v905_v12 }
 0x403   :  { %v922_v21 = vrot.slane %v919_v13, 7  ;;  %v910_v22 = vrot.slane %v907_v14, 7  ;;  %v946_v23 = vrot.slane %v943_v16, 7  ;;  %v934_v24 = vrot.slane %v931_v17, 7 }
 0x404   :  { %v970_v29 = vrot.slane %v967_v19, 7  ;;  %v958_v39 = vrot.slane %v955_v20, 7  ;;  %v994_v45 = vrot.slane %v991_v33, 7  ;;  %v982_v8 = vrot.slane %v979_v40, 7 }
 0x405   :  { %v923_v5 = vsel %vm112_vm6, %v922_v21, %v918_v15  ;;  %v911_v63 = vsel %vm112_vm6, %v910_v22, %v906_v18  ;;  %v947_v37 = vsel %vm112_vm6, %v946_v23, %v942_v25  ;;  %v935_v38 = vsel %vm112_vm6, %v934_v24, %v930_v6 }
 0x406   :  { %v925_v7 = vsel %vm115_vm13, %v923_v5, 0.0  ;;  %v913_v28 = vsel %vm115_vm13, %v911_v63, 0.0  ;;  %v949_v50 = vsel %vm115_vm13, %v947_v37, 0.0  ;;  %v937_v52 = vsel %vm115_vm13, %v935_v38, 0.0 }
 0x407   :  { %926 = vadd.xlane.f32.xlu1 %v925_v7  ;;  %914 = vadd.xlane.f32.xlu0 %v913_v28  ;;  %v971_v53 = vsel %vm112_vm6, %v970_v29, %v966_v41  ;;  %v959_v47 = vsel %vm112_vm6, %v958_v39, %v954_v42  ;;  %v978_v0 = vmul.f32 %v1683_v36, %v896_v4  ;;  %v1052_v38 = vsub.s32 5, %v1729_v51 }
 0x408   :  { %v973_v56 = vsel %vm115_vm13, %v971_v53, 0.0  ;;  %v961_v58 = vsel %vm115_vm13, %v959_v47, 0.0  ;;  %v995_v59 = vsel %vm112_vm6, %v994_v45, %v990_v55  ;;  %v1440_v26 = vpack.c.bf16 %v1294_v11, %v1293_v2  ;;  %v1295_v11 = vld [vmem:[%s2138_s3 + $0x80] sm:$0xff] }
 0x409   :  { %v983_v60 = vsel %vm112_vm6, %v982_v8, %v978_v0  ;;  %v997_v61 = vsel %vm115_vm13, %v995_v59, 0.0  ;;  %v1053_v42 = vrot.slane %v1825_v62, %v1052_v38  ;;  %vm2168_vm6 = vmmov %vm2164_vm1 }
 0x40a   :  { %v985_v9 = vsel %vm115_vm13, %v983_v60, 0.0  ;;  %1441 = vmatprep.subr.bf16.mxu1 %v1440_v26  ;;  %vm2167_vm13 = vmmov %vm2164_vm1 }
 0x40b   :  { %950 = vadd.xlane.f32.xlu1 %v949_v50  ;;  %938 = vadd.xlane.f32.xlu0 %v937_v52 }
 0x40c   :  { %1443 = vmatpush3.bf16.msra.mxu1 %v1440_v26  ;;  %v1296_v26 = vld [vmem:[%s2138_s3 + $0x88] sm:$0xff] }
 0x40f   :  { %974 = vadd.xlane.f32.xlu1 %v973_v56  ;;  %962 = vadd.xlane.f32.xlu0 %v961_v58 }
 0x413   :  { %998 = vadd.xlane.f32.xlu1 %v997_v61  ;;  %986 = vadd.xlane.f32.xlu0 %v985_v9 }
 0x494   :  { %v927_v4 = vpop.xlane.xlu1 %926  ;;  %v915_v12 = vpop.xlane.xlu0 %914 }
 0x495   :  { %v928_v13 = vmul.f32 %v1665_v31, %v927_v4  ;;  %v916_v14 = vmul.f32 %v1655_v27, %v915_v12  ;;  %v1444_v4 = vpack.c.bf16 %v1296_v26, %v1295_v11  ;;  %v1297_v12 = vld [vmem:[%s2138_s3 + $0x90] sm:$0xff] }
 0x497   :  { %v929_v15 = vadd.f32 %v928_v13, %v916_v14  ;;  %1445 = vmatprep.subr.bf16.mxu1 %v1444_v4  ;;  %v1298_v13 = vld [vmem:[%s2138_s3 + $0x98] sm:$0xff] }
 0x498   :  { %v951_v16 = vpop.xlane.xlu1 %950  ;;  %v939_v17 = vpop.xlane.xlu0 %938  ;;  %1447 = vmatpush3.bf16.msra.mxu1 %v1444_v4  ;;  %v1448_v14 = vpack.c.bf16 %v1298_v13, %v1297_v12 }
 0x499   :  { %v940_v18 = vmul.f32 %v1660_v30, %v939_v17  ;;  %v952_v19 = vmul.f32 %v1670_v32, %v951_v16  ;;  %v1299_v16 = vld [vmem:[%s2138_s3 + $0xa0] sm:$0xff]  ;;  %v1300_v17 = vld [vmem:[%s2138_s3 + $0xa8] sm:$0xff] }
 0x49a   :  { %1449 = vmatprep.subr.bf16.mxu1 %v1448_v14 }
 0x49b   :  { %v941_v20 = vadd.f32 %v940_v18, %v929_v15  ;;  %v1452_v18 = vpack.c.bf16 %v1300_v17, %v1299_v16 }
 0x49c   :  { %v975_v21 = vpop.xlane.xlu1 %974  ;;  %v963_v22 = vpop.xlane.xlu0 %962  ;;  %1451 = vmatpush3.bf16.msra.mxu1 %v1448_v14 }
 0x49d   :  { %v953_v23 = vadd.f32 %v952_v19, %v941_v20  ;;  %v964_v24 = vmul.f32 %v1675_v34, %v963_v22  ;;  %v976_v5 = vmul.f32 %v1680_v35, %v975_v21  ;;  %v1044_v34 = vsub.s32 4, %v1729_v51  ;;  %1453 = vmatprep.subr.bf16.mxu1 %v1452_v18 }
 0x49f   :  { %v965_v63 = vadd.f32 %v964_v24, %v953_v23  ;;  %v1301_v23 = vld [vmem:[%s2138_s3 + $0xb0] sm:$0xff]  ;;  %v1302_v24 = vld [vmem:[%s2138_s3 + $0xb8] sm:$0xff]  ;;  %s1571_s3 = smov [#allocation6]  }
 0x4a0   :  { %v999_v25 = vpop.xlane.xlu1 %998  ;;  %v987_v31 = vpop.xlane.xlu0 %986  ;;  %1455 = vmatpush3.bf16.msra.mxu1 %v1452_v18  ;;  %s1257_s10 = sshll.u32 %s1571_s3, 4  ;;  %s1258_s10 = int_to_ptr.vmem [resolvable:$true] %s1257_s10 }
 0x4a1   :  { %v977_v6 = vadd.f32 %v976_v5, %v965_v63  ;;  %v988_v27 = vmul.f32 %v1683_v36, %v987_v31  ;;  %v1000_v7 = vmul.f32 %v1698_v48, %v999_v25  ;;  %v1045_v36 = vrot.slane %v1825_v62, %v1044_v34  ;;  %p1541_p9 = scmp.lt.s32.totalorder %s1258_s10, %s1258_s10 }
 0x4a2   :  { %v1456_v25 = vpack.c.bf16 %v1302_v24, %v1301_v23 }
 0x4a3   :  { %v989_v28 = vadd.f32 %v988_v27, %v977_v6 }
 0x4a4   :  { %1457 = vmatprep.subr.bf16.mxu1 %v1456_v25 }
 0x4a5   :  { %v1001_v30 = vadd.f32 %v1000_v7, %v989_v28  ;;  %1459 = vmatpush3.bf16.msra.mxu1 %v1456_v25 }
 0x4a7   :  { %v1002_v29 = vmul.f32 0.015625, %v1001_v30 }
 0x4a9   :  { %v1003_v32 = vadd.f32 1e-06, %v1002_v29 }
 0x4ab   :  { %1492 = vrsqrt.f32 %v1003_v32 }
 0x4b5   :  { %v1493_v33 = vpop.eup %1492 }
 0x4b6   :  { %v1012_v37 = vrot.slane %v1493_v33, %v1733_v54 }
 0x4b8   :  { %v1020_v35 = vrot.slane %v1012_v37, %v1733_v54  ;;  %v1013_v39 = vcombine.high %v1012_v37, %v1012_v37 }
 0x4ba   :  { %v1031_v40 = vrot.slane %v1020_v35, %v1736_v57  ;;  %v1027_v48 = vrot.slane %v1013_v39, %v1733_v54  ;;  %v1145_v39 = vsub.s32 6, %v1729_v51 }
 0x4bc   :  { %v1039_v41 = vmul.f32 %v1031_v40, %v1981_v44  ;;  %v1038_v50 = vmul.f32 %v1031_v40, %v1978_v43  ;;  %v1035_v52 = vrot.slane %v1027_v48, %v1736_v57  ;;  %v1146_v40 = vrot.slane %v1825_v62, %v1145_v39 }
 0x4be   :  { %v1047_v53 = vmul.f32 %v1045_v36, %v1039_v41  ;;  %v1046_v47 = vmul.f32 %v1045_v36, %v1038_v50  ;;  %v1040_v45 = vmul.f32 %v1035_v52, %v1984_v46  ;;  %v1041_v8 = vmul.f32 %v1035_v52, %v1987_v49  ;;  %v1510_v50 = vld [vmem:[#allocation3 + $0x8] sm:$0xff] }
 0x4c0   :  { %v1055_v55 = vadd.f32 %v1053_v42, %v1047_v53  ;;  %v1054_v0 = vadd.f32 %v1053_v42, %v1046_v47  ;;  %v1048_v56 = vmul.f32 %v1045_v36, %v1040_v45  ;;  %v1049_v58 = vmul.f32 %v1045_v36, %v1041_v8  ;;  %v1511_v53 = vld [vmem:[#allocation3] sm:$0xff] }
 0x4c2   :  { %v1288_v59 = vmul.f32 -1.442695, %v1055_v55  ;;  %v1287_v54 = vmul.f32 -1.442695, %v1054_v0  ;;  %v1056_v60 = vadd.f32 %v1053_v42, %v1048_v56  ;;  %v1057_v44 = vadd.f32 %v1053_v42, %v1049_v58  ;;  %v1513_v56 = vld [vmem:[#allocation3 + $0x10] sm:$0xff] }
 0x4c4   :  { %1494 = vpow2.f32 %v1288_v59  ;;  %v1289_v61 = vmul.f32 -1.442695, %v1056_v60  ;;  %v1290_v9 = vmul.f32 -1.442695, %v1057_v44 }
 0x4c5   :  { %1496 = vpow2.f32 %v1287_v54 }
 0x4c6   :  { %1498 = vpow2.f32 %v1289_v61 }
 0x4c7   :  { %1500 = vpow2.f32 %v1290_v9 }
 0x4ce   :  { %v1495_v57 = vpop.eup %1494 }
 0x4cf   :  { %v1497_v43 = vpop.eup %1496  ;;  %v1071_v10 = vadd.f32 1.0, %v1495_v57 }
 0x4d0   :  { %v1499_v46 = vpop.eup %1498  ;;  %v1070_v1 = vadd.f32 1.0, %v1497_v43 }
 0x4d1   :  { %v1501_v49 = vpop.eup %1500  ;;  %1502 = vrcp.f32 %v1071_v10  ;;  %v1072_v2 = vadd.f32 1.0, %v1499_v46 }
 0x4d2   :  { %1504 = vrcp.f32 %v1070_v1  ;;  %v1073_v3 = vadd.f32 1.0, %v1501_v49 }
 0x4d3   :  { %1506 = vrcp.f32 %v1072_v2 }
 0x4d4   :  { %1508 = vrcp.f32 %v1073_v3 }
 0x4db   :  { %v1503_v15 = vpop.eup %1502 }
 0x4dc   :  { %v1505_v19 = vpop.eup %1504  ;;  %v1083_v20 = vmul.f32 %v1503_v15, %v1055_v55 }
 0x4dd   :  { %v1507_v21 = vpop.eup %1506  ;;  %v1082_v22 = vmul.f32 %v1505_v19, %v1054_v0  ;;  %v1512_v0 = vld [vmem:[#allocation3 + $0x18] sm:$0xff] }
 0x4de   :  { %v1509_v5 = vpop.eup %1508  ;;  %1105 = vrot.lane.b32.xlu1 %v1083_v20, %s1569_s11  ;;  %1100 = vst.msk [vmem:[#allocation2 + $0x9] sm:$0x7f] %vm458_vm15, %v1083_v20  ;;  %v1084_v63 = vmul.f32 %v1507_v21, %v1056_v60 }
 0x4df   :  { %1103 = vrot.lane.b32.xlu0 %v1082_v22, %s1569_s11  ;;  %1099 = vst.msk [vmem:[#allocation2 + $0x1] sm:$0xff] %vm2167_vm13, %v1082_v22  ;;  %v1085_v31 = vmul.f32 %v1509_v5, %v1057_v44 }
 0x4e0   :  { %1119 = vst.msk [vmem:[#allocation2 + $0x11] sm:$0xff] %vm2168_vm6, %v1084_v63 }
 0x4e1   :  { %1120 = vst.msk [vmem:[#allocation2 + $0x19] sm:$0x7f] %vm458_vm15, %v1085_v31  ;;  %vm2169_vm15 = vmmov %vm2164_vm1 }
 0x4e2   :  { %1111 = vrot.lane.b32.xlu1 %v1082_v22, %s1570_s12 }
 0x4e3   :  { %1123 = vrot.lane.b32.xlu0 %v1084_v63, %s1569_s11 }
 0x4e6   :  { %1113 = vrot.lane.b32.xlu1 %v1083_v20, %s1570_s12 }
 0x4e7   :  { %1131 = vrot.lane.b32.xlu0 %v1084_v63, %s1570_s12 }
 0x4ea   :  { %1125 = vrot.lane.b32.xlu1 %v1085_v31, %s1569_s11  ;;  %s1536_s11 = scalar_lea.vmem %s1258_s10, 512 }
 0x4eb   :  { %p1537_p8 = scmp.ne.s32.totalorder %s1258_s10, %s1536_s11  ;;  %p1542_p10 = scmp.lt.s32.totalorder %s1536_s11, %s1536_s11 }
 0x4ed   :  { %p1543_p11 = por %p1542_p10, %p1541_p9 }
 0x4ee   :  { %1133 = vrot.lane.b32.xlu1 %v1085_v31, %s1570_s12 }
 0x4ef   :  { %p1544_p12 = pnand %p1543_p11, %p1537_p8 }
 0x550   :  { %v1106_v6 = vpop.permute.xlu1 %1105 }
 0x551   :  { %1110 = vst.msk [vmem:[#allocation2 + $0x8] sm:$0xff] %vm468_vm5, %v1106_v6  ;;  %v1104_v27 = vpop.permute.xlu0 %1103 }
 0x552   :  { %1109 = vst.msk [vmem:[#allocation2] sm:$0xff] %vm468_vm5, %v1104_v27 }
 0x554   :  { %v1112_v7 = vpop.permute.xlu1 %1111 }
 0x555   :  { %1117 = vst.msk [vmem:[#allocation2 - $0x1] sm:$0xfe] %vm477_vm8, %v1112_v7  ;;  %v1124_v28 = vpop.permute.xlu0 %1123 }
 0x556   :  { %1129 = vst.msk [vmem:[#allocation2 + $0x10] sm:$0xff] %vm468_vm5, %v1124_v28 }
 0x558   :  { %v1114_v30 = vpop.permute.xlu1 %1113 }
 0x559   :  { %1118 = vst.msk [vmem:[#allocation2 + $0x7] sm:$0xff] %vm479_vm7, %v1114_v30  ;;  %v1132_v29 = vpop.permute.xlu0 %1131 }
 0x55a   :  { %1137 = vst.msk [vmem:[#allocation2 + $0xf] sm:$0xfe] %vm477_vm8, %v1132_v29  ;;  %vm2172_vm8 = vmmov %vm2164_vm1 }
 0x55c   :  { %v1126_v32 = vpop.permute.xlu1 %1125 }
 0x55d   :  { %1130 = vst.msk [vmem:[#allocation2 + $0x18] sm:$0xff] %vm468_vm5, %v1126_v32  ;;  %vm2171_vm5 = vmmov %vm2164_vm1 }
 0x560   :  { %v1134_v33 = vpop.permute.xlu1 %1133  ;;  %v1139_v37 = vld [vmem:[#allocation2] sm:$0xff]  ;;  %v1140_v34 = vld [vmem:[#allocation2 + $0x8] sm:$0xff] }
 0x561   :  { %1138 = vst.msk [vmem:[#allocation2 + $0x17] sm:$0xff] %vm479_vm7, %v1134_v33  ;;  %1403 = vmatprep.mubr.msk.f32.mxu1 %vm509_vm0, %v1139_v37 }
 0x562   :  { %1404 = vmatmul.mubr.msk.f32.vlgmr.msra.gmra.mrb[2].mxu1 %vm509_vm0, %v1140_v34 }
 0x568   :  { %v1141_v35 = vld [vmem:[#allocation2 + $0x10] sm:$0xff]  ;;  %v1142_v38 = vld [vmem:[#allocation2 + $0x18] sm:$0xff] }
 0x569   :  { %1406 = vmatprep.mubr.msk.f32.mxu1 %vm509_vm0, %v1141_v35 }
 0x56a   :  { %1407 = vmatmul.mubr.msk.f32.gmra.mrb[4].mxu1 %vm509_vm0, %v1142_v38 }
 0x635   :  { %v1405_v36 = vpop.f32.mrb[2].mxu1 }
 0x636   :  { %v1231_v48 = vadd.f32 %v1405_v36, %v1146_v40  ;;  %v1225_v41 = vpop.f32.mrb[3].mxu1 }
 0x637   :  { %v1226_v42 = vadd.f32 %v1225_v41, %v1146_v40 }
 0x638   :  { %v1245_v52 = vadd.f32 %v1510_v50, %v1231_v48 }
 0x639   :  { %v1244_v47 = vadd.f32 %v1511_v53, %v1226_v42 }
 0x63a   :  { %1249 = vst.msk [vmem:[#allocation6 + $0x8] sm:$0xff] %vm2169_vm15, %v1245_v52 }
 0x63b   :  { %1248 = vst.msk [vmem:[#allocation6] sm:$0xff] %vm2170_vm4, %v1244_v47 }
 0x63d   :  { %v1408_v45 = vpop.f32.mrb[4].mxu1 }
 0x63e   :  { %v1241_v8 = vadd.f32 %v1408_v45, %v1146_v40  ;;  %v1235_v55 = vpop.f32.mrb[5].mxu1 }
 0x63f   :  { %v1236_v51 = vadd.f32 %v1235_v55, %v1146_v40 }
 0x640   :  { %v1247_v62 = vadd.f32 %v1512_v0, %v1241_v8 }
 0x641   :  { %v1246_v58 = vadd.f32 %v1513_v56, %v1236_v51 }
 0x642   :  { %1251 = vst.msk [vmem:[#allocation6 + $0x18] sm:$0xff] %vm2171_vm5, %v1247_v62 }
 0x643   :  { %1250 = vst.msk [vmem:[#allocation6 + $0x10] sm:$0xff] %vm2172_vm8, %v1246_v58 }
 0x644   :  { %1547 = shalt.err (!%p1544_p12)
}
 0x645   :  { %s1548_s14 = scalar_lea.hbm %s2140_s5, 512 }
 0x646   :  { %p1549_p13 = scmp.ne.s32.totalorder %s2140_s5, %s1548_s14  ;;  %p1552_p0 = scmp.lt.u32.totalorder %s1548_s14, %s2140_s5 }
 0x648   :  { %p1554_p1 = pnand %p1552_p0, %p1549_p13 }
 0x64a   :  { %1557 = shalt.err (!%p1554_p1)
}
 0x64b   :  { %1263 = dma.vmem_to_hbm [thread:$0]  %s1258_s10, 512, %s2140_s5, [#allocation5], %s1563_s28, %s1563_s28, %s1564_s29  }
 0x64c   :  { %1560 = dma.done.wait [#allocation5], 512  }
 0x64d   :  { %1561 = vsyncadd [#allocation5], 4294966784 }
 0x64e   :  { %1267 = vsyncpa [#allocation4], 1 }
 0x64f   :  { %1268 = vsyncpa [#allocation5], 1 }

</bundles_post_ra>
